<compile_context>
chip_gen: v7x
topology: tpu7x:2x2x1
jax: 0.10.0
libtpu: 0.0.40
codegen_flags: <defaults>
</compile_context>

<pallas_src>
import functools

import jax
import jax.numpy as jnp
from jax import lax
from jax.experimental import pallas as pl
from jax.experimental.pallas import tpu as pltpu


# ----------------------------------------------------------------------------
# Fused kernel: input linear + all GAT/LayerNorm/LeakyReLU layers
# ----------------------------------------------------------------------------
def _fused_graph_encoder_kernel(x_ref, adj_ref, w_in_ref, b_in_ref,
                                w_ref, vec_ref, o_ref, *, e_real, fold_dst):
    """All layers in one kernel; h and adjacency stay resident in VMEM.

    x_ref:    (N_pad, F_pad)   padded input node features (f32 or bf16)
    adj_ref:  (N_pad, N_pad)   log_cnt[i, j] (bf16 or f32): log multiplicity of
                               edge j -> i on edges, -1e30 off edges
    w_in_ref: (F_pad, E_pad)   input linear weight (x @ W), MXU dtype
    b_in_ref: (1, E_pad)       f32
    w_ref:    (L, E_pad, E_pad) stacked GAT weights (h @ W), MXU dtype;
                               if fold_dst, column e_real holds W @ a_dst^T
    vec_ref:  (L, 5, E_pad)    f32 rows = [a_src, a_dst, bias, gamma, beta]
    o_ref:    (L+1, N_pad, E_pad) f32: h after input linear and after every layer
    """
    num_layers = w_ref.shape[0]
    e_pad = w_ref.shape[-1]
    mxu_dtype = w_ref.dtype

    # ---- input Linear + LeakyReLU(0.01) ----
    y = jnp.dot(x_ref[...], w_in_ref[...],
                preferred_element_type=jnp.float32) + b_in_ref[...]
    h = jnp.maximum(y, 0.01 * y)
    o_ref[0] = h

    # ---- precompute once (hoisted out of the layer loop) ----
    log_cnt = adj_ref[...].astype(jnp.float32)       # (N, N)
    # lane mask for the real (unpadded) feature columns, used by LayerNorm and
    # to re-zero the folded score column of wh.
    feat_mask = (lax.broadcasted_iota(jnp.int32, (1, e_pad), 1)
                 < e_real).astype(jnp.float32)
    inv_e = jnp.float32(1.0 / e_real)

    # Static unroll over the (small, fixed) layer count.
    for l in range(num_layers):
        w = w_ref[l]                                  # (E_pad, E_pad), MXU dtype
        vecs = vec_ref[l]                             # (5, E_pad) f32
        a_src = vecs[0:1, :]
        a_dst = vecs[1:2, :]
        b_gat = vecs[2:3, :]
        gamma = vecs[3:4, :]
        beta = vecs[4:5, :]

        # GAT linear on the MXU (bf16 operands, f32 accumulate).
        wh = jnp.dot(h.astype(mxu_dtype), w,
                     preferred_element_type=jnp.float32)          # (N, E_pad)

        # Per-destination score: folded into a pad column of W when available,
        # otherwise a skinny bf16 matvec.
        if fold_dst:
            s_dst = wh[:, e_real:e_real + 1]                       # (N, 1)
            # Re-zero pad + score lanes so downstream sums see exact zeros.
            wh = wh * feat_mask
        else:
            s_dst = lax.dot_general(wh.astype(mxu_dtype), a_dst.astype(mxu_dtype),
                                    (((1,), (1,)), ((), ())),
                                    preferred_element_type=jnp.float32)

        wh_mxu = wh.astype(mxu_dtype)

        # Per-source score as one small MXU matvec -> (1, N).
        s_src = lax.dot_general(a_src.astype(mxu_dtype), wh_mxu,
                                (((1,), (1,)), ((), ())),
                                preferred_element_type=jnp.float32)

        #   e[i, j] = LeakyReLU_0.2( a_dst . Wh_i + a_src . Wh_j ) + log cnt[i,j]
        e = s_dst + s_src                                           # (N, N)
        e = jnp.maximum(e, 0.2 * e) + log_cnt

        # Masked softmax over sources j.  Clamping m at -1e20 keeps rows with no
        # incoming edges at denom==0 -> all-zero attention row (matches
        # add_self_loops=False behaviour); do NOT switch -1e30 to -inf.
        m = jnp.maximum(jnp.max(e, axis=-1, keepdims=True), -1e20)
        p = jnp.exp(e - m)
        denom = jnp.sum(p, axis=-1, keepdims=True)
        attn = p * pl.reciprocal(jnp.maximum(denom, 1e-16), approx=True)

        out = jnp.dot(attn.astype(mxu_dtype), wh_mxu,
                      preferred_element_type=jnp.float32) + b_gat   # (N, E)

        # LayerNorm over the real feature lanes only (pad lanes are exact zero).
        mu = jnp.sum(out, axis=-1, keepdims=True) * inv_e
        cen = (out - mu) * feat_mask
        var = jnp.sum(cen * cen, axis=-1, keepdims=True) * inv_e
        yln = cen * lax.rsqrt(var + 1e-5) * gamma + beta

        # LeakyReLU(0.01); dropout(p=0.3, eval) and pooling are identity.
        h = jnp.maximum(yln, 0.01 * yln)
        o_ref[l + 1] = h


# ----------------------------------------------------------------------------
# Wrapper
# ----------------------------------------------------------------------------
def _round_up(v, m):
    return ((v + m - 1) // m) * m


@functools.partial(jax.jit, static_argnames=("e_real", "fold_dst"))
def _fused_forward(x_p, adj_log_cnt, w_in_p, b_in_p, w_stack, vec_stack,
                   *, e_real, fold_dst):
    num_layers, e_pad, _ = w_stack.shape
    n_pad, f_pad = x_p.shape

    flops = (2 * n_pad * f_pad * e_pad
             + num_layers * (2 * n_pad * e_pad * e_pad      # h @ W
                             + 2 * n_pad * e_pad            # a_src matvec
                             + 2 * n_pad * n_pad * e_pad    # attn @ Wh
                             + 8 * n_pad * n_pad))          # softmax VPU work
    transcendentals = num_layers * (n_pad * n_pad + 2 * n_pad)

    in_bytes = sum(int(a.size) * a.dtype.itemsize
                   for a in (x_p, adj_log_cnt, w_in_p, b_in_p, w_stack, vec_stack))
    out_bytes = 4 * (num_layers + 1) * n_pad * e_pad
    bytes_accessed = in_bytes + out_bytes

    # Size scoped VMEM from the actual footprint (default 16/32 MiB is far
    # below physical); temps ~ a few (N,N) + (N,E) f32 live tensors.
    tmp_bytes = 4 * (4 * n_pad * n_pad + 6 * n_pad * e_pad)
    vmem_limit = int(min(max(in_bytes + out_bytes + tmp_bytes + (8 << 20),
                             32 << 20),
                         120 << 20))

    kernel = functools.partial(_fused_graph_encoder_kernel,
                               e_real=e_real, fold_dst=fold_dst)
    return pl.pallas_call(
        kernel,
        out_shape=jax.ShapeDtypeStruct((num_layers + 1, n_pad, e_pad),
                                       jnp.float32),
        in_specs=[pl.BlockSpec(memory_space=pltpu.MemorySpace.VMEM)] * 6,
        out_specs=pl.BlockSpec(memory_space=pltpu.MemorySpace.VMEM),
        compiler_params=pltpu.CompilerParams(vmem_limit_bytes=vmem_limit),
        cost_estimate=pl.CostEstimate(flops=flops,
                                      transcendentals=transcendentals,
                                      bytes_accessed=bytes_accessed),
    )(x_p, adj_log_cnt, w_in_p, b_in_p, w_stack, vec_stack)


def graph_encoder_forward(x, edge_index, params, use_bf16_matmul=True):
    """Full forward pass (eval mode). Returns (x, x, layer_data, edge_index, batch).

    Note: with use_bf16_matmul=True, matmul operands are requantized to bf16
    each layer (f32 accumulation), so results drift slightly from an f32
    reference across layers; set use_bf16_matmul=False for full f32 matmuls.
    """
    n, f = x.shape
    e = params["w_in"].shape[1]
    num_layers = len(params["layers"])

    row_mult = 16 if use_bf16_matmul else 8      # bf16 vregs pack 16 sublanes
    n_pad = _round_up(max(n, row_mult), row_mult)
    f_pad = _round_up(f, 128)
    e_pad = _round_up(e, 128)
    fold_dst = e < e_pad                          # need a free pad column for a_dst fold

    mxu_dtype = jnp.bfloat16 if use_bf16_matmul else jnp.float32
    adj_dtype = jnp.bfloat16 if use_bf16_matmul else jnp.float32

    # Pad inputs / params with zeros; the kernel keeps pad lanes exactly zero.
    x_p = jnp.zeros((n_pad, f_pad), jnp.float32).at[:n, :f].set(
        x.astype(jnp.float32)).astype(mxu_dtype)

    # Dense edge log-multiplicities: log_cnt[dst, src] = log(#edges src -> dst)
    # on edges, -1e30 off edges.
    cnt = jnp.zeros((n_pad, n_pad), jnp.float32).at[
        edge_index[1], edge_index[0]].add(1.0)
    adj_log_cnt = jnp.where(cnt > 0.0,
                            jnp.log(jnp.maximum(cnt, 1.0)),
                            jnp.float32(-1e30)).astype(adj_dtype)

    w_in_p = jnp.zeros((f_pad, e_pad), jnp.float32).at[:f, :e].set(
        params["w_in"]).astype(mxu_dtype)
    b_in_p = jnp.zeros((1, e_pad), jnp.float32).at[:, :e].set(params["b_in"])

    w_stack = jnp.zeros((num_layers, e_pad, e_pad), jnp.float32)
    vec_stack = jnp.zeros((num_layers, 5, e_pad), jnp.float32)
    for l, lp in enumerate(params["layers"]):
        w_stack = w_stack.at[l, :e, :e].set(lp["w"])
        if fold_dst:
            # Fold the per-destination score vector into pad column `e`:
            # (h @ W) . a_dst == h @ (W @ a_dst^T).
            col_dst = lp["w"] @ lp["a_dst"][0]
            w_stack = w_stack.at[l, :e, e].set(col_dst)
        vec_stack = (vec_stack
                     .at[l, 0, :e].set(lp["a_src"][0])
                     .at[l, 1, :e].set(lp["a_dst"][0])
                     .at[l, 2, :e].set(lp["b"][0])
                     .at[l, 3, :e].set(lp["gamma"][0])
                     .at[l, 4, :e].set(lp["beta"][0]))
    w_stack = w_stack.astype(mxu_dtype)

    h_all = _fused_forward(x_p, adj_log_cnt, w_in_p, b_in_p, w_stack, vec_stack,
                           e_real=e, fold_dst=fold_dst)
    h_all = h_all[:, :n, :e]

    layer_data = [(h_all[0], edge_index, None, None, None, n)]
    for l in range(num_layers):
        # dropout (eval) and pooling are identity -> graph structure unchanged
        layer_data.append((h_all[l + 1], edge_index, None, None, None, n))

    h_final = h_all[-1]
    return h_final, h_final, layer_data, edge_index, None


# ----------------------------------------------------------------------------
# Deterministic parameter init
# ----------------------------------------------------------------------------
def make_params(num_features, embedding_size, num_layers, key):
    keys = jax.random.split(key, 2 + 4 * num_layers)
    params = {
        "w_in": 0.1 * jax.random.normal(keys[0], (num_features, embedding_size),
                                        dtype=jnp.float32),
        "b_in": 0.1 * jax.random.normal(keys[1], (1, embedding_size),
                                        dtype=jnp.float32),
        "layers": [],
    }
    for i in range(num_layers):
        k = keys[2 + 4 * i: 2 + 4 * (i + 1)]
        params["layers"].append({
            "w": 0.1 * jax.random.normal(k[0], (embedding_size, embedding_size),
                                         dtype=jnp.float32),
            "a_src": 0.1 * jax.random.normal(k[1], (1, embedding_size),
                                             dtype=jnp.float32),
            "a_dst": 0.1 * jax.random.normal(k[2], (1, embedding_size),
                                             dtype=jnp.float32),
            "b": 0.1 * jax.random.normal(k[3], (1, embedding_size),
                                         dtype=jnp.float32),
            "gamma": jnp.ones((1, embedding_size), dtype=jnp.float32),
            "beta": jnp.zeros((1, embedding_size), dtype=jnp.float32),
        })
    return params


# ----------------------------------------------------------------------------
# Main
# ----------------------------------------------------------------------------
if __name__ == "__main__":
    num_nodes = 16
    num_features = 8
    embedding_size = 32
    num_layers = 4

    key = jax.random.PRNGKey(0)
    k_x, k_e, k_p = jax.random.split(key, 3)

    x = jax.random.normal(k_x, (num_nodes, num_features), dtype=jnp.float32)

    # Random undirected edge set (edge_index is (2, E) as in PyG).
    num_edges = 24
    src = jax.random.randint(k_e, (num_edges,), 0, num_nodes)
    dst = jax.random.randint(jax.random.fold_in(k_e, 1), (num_edges,), 0, num_nodes)
    edge_index = jnp.stack(
        [jnp.concatenate([src, dst]), jnp.concatenate([dst, src])], axis=0
    ).astype(jnp.int32)

    params = make_params(num_features, embedding_size, num_layers, k_p)

    out, out_dup, layer_data, new_edge_index, new_batch = graph_encoder_forward(
        x, edge_index, params, use_bf16_matmul=True)
    jax.block_until_ready(out)

    assert out.shape == (num_nodes, embedding_size)
    assert len(layer_data) == num_layers + 1
    assert bool(jnp.all(jnp.isfinite(out)))
    print("KERNEL_OK")
</pallas_src>

<mosaic_0001>
module attributes {stable_mosaic.version = 11 : i64} {
  func.func @_fused_graph_encoder_kernel(%arg0: memref<16x128xbf16, #tpu.memory_space<vmem>>, %arg1: memref<16x16xbf16, #tpu.memory_space<vmem>>, %arg2: memref<128x128xbf16, #tpu.memory_space<vmem>>, %arg3: memref<1x128xf32, #tpu.memory_space<vmem>>, %arg4: memref<4x128x128xbf16, #tpu.memory_space<vmem>>, %arg5: memref<4x5x128xf32, #tpu.memory_space<vmem>>, %arg6: memref<5x16x128xf32, #tpu.memory_space<vmem>>) attributes {dimension_semantics = [], scalar_prefetch = 0 : i64, scratch_operands = 0 : i64, tpu.core_type = #tpu.core_type<tc>} {
    %c0 = arith.constant 0 : index
    %c0_0 = arith.constant 0 : index
    %0 = vector.load %arg0[%c0, %c0_0] : memref<16x128xbf16, #tpu.memory_space<vmem>>, vector<16x128xbf16>
    %c0_1 = arith.constant 0 : index
    %c0_2 = arith.constant 0 : index
    %1 = vector.load %arg2[%c0_1, %c0_2] : memref<128x128xbf16, #tpu.memory_space<vmem>>, vector<128x128xbf16>
    %cst = arith.constant dense<0.000000e+00> : vector<16x128xf32>
    %2 = tpu.matmul %0, %1, %cst {dimension_numbers = #tpu.dot_dimension_numbers<[1], [0], [0], [1], [0, 0, 1, 1], [], []>} : vector<16x128xbf16>, vector<128x128xbf16>, vector<16x128xf32> -> vector<16x128xf32>
    %c0_3 = arith.constant 0 : index
    %c0_4 = arith.constant 0 : index
    %3 = vector.load %arg3[%c0_3, %c0_4] : memref<1x128xf32, #tpu.memory_space<vmem>>, vector<1x128xf32>
    %4 = vector.broadcast %3 : vector<1x128xf32> to vector<16x128xf32>
    %5 = arith.addf %2, %4 : vector<16x128xf32>
    %cst_5 = arith.constant 0.00999999977 : f32
    %6 = vector.broadcast %cst_5 : f32 to vector<16x128xf32>
    %7 = arith.mulf %6, %5 : vector<16x128xf32>
    %8 = arith.maximumf %5, %7 : vector<16x128xf32>
    %c0_6 = arith.constant 0 : index
    %c0_7 = arith.constant 0 : index
    %c0_8 = arith.constant 0 : index
    %9 = vector.load %arg6[%c0_6, %c0_7, %c0_8] : memref<5x16x128xf32, #tpu.memory_space<vmem>>, vector<1x16x128xf32>
    %10 = vector.shape_cast %9 : vector<1x16x128xf32> to vector<16x128xf32>
    %11 = vector.shape_cast %8 : vector<16x128xf32> to vector<1x16x128xf32>
    tpu.vector_store %arg6[%c0_6, %c0_7, %c0_8], %11 {strides = array<i32>} : memref<5x16x128xf32, #tpu.memory_space<vmem>>, vector<1x16x128xf32>,
    %c0_9 = arith.constant 0 : index
    %c0_10 = arith.constant 0 : index
    %12 = vector.load %arg1[%c0_9, %c0_10] : memref<16x16xbf16, #tpu.memory_space<vmem>>, vector<16x16xbf16>
    %13 = arith.extf %12 : vector<16x16xbf16> to vector<16x16xf32>
    %14 = tpu.iota {dimensions = array<i32: 1>} : vector<1x128xi32>
    %c32_i32 = arith.constant 32 : i32
    %15 = vector.broadcast %c32_i32 : i32 to vector<1x128xi32>
    %16 = arith.cmpi slt, %14, %15 : vector<1x128xi32>
    %17 = arith.extui %16 : vector<1x128xi1> to vector<1x128xi32>
    %18 = arith.sitofp %17 : vector<1x128xi32> to vector<1x128xf32>
    %c0_11 = arith.constant 0 : index
    %c0_12 = arith.constant 0 : index
    %c0_13 = arith.constant 0 : index
    %19 = vector.load %arg4[%c0_11, %c0_12, %c0_13] : memref<4x128x128xbf16, #tpu.memory_space<vmem>>, vector<1x128x128xbf16>
    %20 = vector.shape_cast %19 : vector<1x128x128xbf16> to vector<128x128xbf16>
    %c0_14 = arith.constant 0 : index
    %c0_15 = arith.constant 0 : index
    %c0_16 = arith.constant 0 : index
    %21 = vector.load %arg5[%c0_14, %c0_15, %c0_16] : memref<4x5x128xf32, #tpu.memory_space<vmem>>, vector<1x5x128xf32>
    %22 = vector.shape_cast %21 : vector<1x5x128xf32> to vector<5x128xf32>
    %23 = vector.extract_strided_slice %22 {offsets = [0, 0], sizes = [1, 128], strides = [1, 1]} : vector<5x128xf32> to vector<1x128xf32>
    %24 = vector.extract_strided_slice %22 {offsets = [2, 0], sizes = [1, 128], strides = [1, 1]} : vector<5x128xf32> to vector<1x128xf32>
    %25 = vector.extract_strided_slice %22 {offsets = [3, 0], sizes = [1, 128], strides = [1, 1]} : vector<5x128xf32> to vector<1x128xf32>
    %26 = vector.extract_strided_slice %22 {offsets = [4, 0], sizes = [1, 128], strides = [1, 1]} : vector<5x128xf32> to vector<1x128xf32>
    %27 = arith.truncf %8 : vector<16x128xf32> to vector<16x128xbf16>
    %cst_17 = arith.constant dense<0.000000e+00> : vector<16x128xf32>
    %28 = tpu.matmul %27, %20, %cst_17 {dimension_numbers = #tpu.dot_dimension_numbers<[1], [0], [0], [1], [0, 0, 1, 1], [], []>} : vector<16x128xbf16>, vector<128x128xbf16>, vector<16x128xf32> -> vector<16x128xf32>
    %29 = vector.extract_strided_slice %28 {offsets = [0, 32], sizes = [16, 1], strides = [1, 1]} : vector<16x128xf32> to vector<16x1xf32>
    %30 = vector.broadcast %18 : vector<1x128xf32> to vector<16x128xf32>
    %31 = arith.mulf %28, %30 : vector<16x128xf32>
    %32 = arith.truncf %31 : vector<16x128xf32> to vector<16x128xbf16>
    %33 = arith.truncf %23 : vector<1x128xf32> to vector<1x128xbf16>
    %cst_18 = arith.constant dense<0.000000e+00> : vector<1x16xf32>
    %34 = tpu.matmul %33, %32, %cst_18 {dimension_numbers = #tpu.dot_dimension_numbers<[1], [1], [0], [0], [0, 0, 1, 0], [], []>} : vector<1x128xbf16>, vector<16x128xbf16>, vector<1x16xf32> -> vector<1x16xf32>
    %35 = vector.broadcast %29 : vector<16x1xf32> to vector<16x16xf32>
    %36 = vector.broadcast %34 : vector<1x16xf32> to vector<16x16xf32>
    %37 = arith.addf %35, %36 : vector<16x16xf32>
    %cst_19 = arith.constant 2.000000e-01 : f32
    %38 = vector.broadcast %cst_19 : f32 to vector<16x16xf32>
    %39 = arith.mulf %38, %37 : vector<16x16xf32>
    %40 = arith.maximumf %37, %39 : vector<16x16xf32>
    %41 = arith.addf %40, %13 : vector<16x16xf32>
    %cst_20 = arith.constant dense<0xFF800000> : vector<16xf32>
    %42 = vector.multi_reduction <maximumf>, %41, %cst_20 [1] : vector<16x16xf32> to vector<16xf32>
    %43 = vector.shape_cast %42 : vector<16xf32> to vector<16x1xf32>
    %cst_21 = arith.constant -1.000000e+20 : f32
    %44 = vector.broadcast %cst_21 : f32 to vector<16x1xf32>
    %45 = arith.maximumf %43, %44 : vector<16x1xf32>
    %46 = vector.broadcast %45 : vector<16x1xf32> to vector<16x16xf32>
    %47 = arith.subf %41, %46 : vector<16x16xf32>
    %48 = math.exp %47 : vector<16x16xf32>
    %cst_22 = arith.constant dense<0.000000e+00> : vector<16xf32>
    %49 = vector.multi_reduction <add>, %48, %cst_22 [1] : vector<16x16xf32> to vector<16xf32>
    %50 = vector.shape_cast %49 : vector<16xf32> to vector<16x1xf32>
    %cst_23 = arith.constant 1.000000e-16 : f32
    %51 = vector.broadcast %cst_23 : f32 to vector<16x1xf32>
    %52 = arith.maximumf %50, %51 : vector<16x1xf32>
    %53 = tpu.reciprocal %52 {approx = true} : vector<16x1xf32> -> vector<16x1xf32>
    %54 = vector.broadcast %53 : vector<16x1xf32> to vector<16x16xf32>
    %55 = arith.mulf %48, %54 : vector<16x16xf32>
    %56 = arith.truncf %55 : vector<16x16xf32> to vector<16x16xbf16>
    %cst_24 = arith.constant dense<0.000000e+00> : vector<16x128xf32>
    %57 = tpu.matmul %56, %32, %cst_24 {dimension_numbers = #tpu.dot_dimension_numbers<[1], [0], [0], [1], [0, 0, 1, 1], [], []>} : vector<16x16xbf16>, vector<16x128xbf16>, vector<16x128xf32> -> vector<16x128xf32>
    %58 = vector.broadcast %24 : vector<1x128xf32> to vector<16x128xf32>
    %59 = arith.addf %57, %58 : vector<16x128xf32>
    %cst_25 = arith.constant dense<0.000000e+00> : vector<16xf32>
    %60 = vector.multi_reduction <add>, %59, %cst_25 [1] : vector<16x128xf32> to vector<16xf32>
    %61 = vector.shape_cast %60 : vector<16xf32> to vector<16x1xf32>
    %cst_26 = arith.constant 3.125000e-02 : f32
    %62 = vector.broadcast %cst_26 : f32 to vector<16x1xf32>
    %63 = arith.mulf %61, %62 : vector<16x1xf32>
    %64 = vector.broadcast %63 : vector<16x1xf32> to vector<16x128xf32>
    %65 = arith.subf %59, %64 : vector<16x128xf32>
    %66 = vector.broadcast %18 : vector<1x128xf32> to vector<16x128xf32>
    %67 = arith.mulf %65, %66 : vector<16x128xf32>
    %68 = arith.mulf %67, %67 : vector<16x128xf32>
    %cst_27 = arith.constant dense<0.000000e+00> : vector<16xf32>
    %69 = vector.multi_reduction <add>, %68, %cst_27 [1] : vector<16x128xf32> to vector<16xf32>
    %70 = vector.shape_cast %69 : vector<16xf32> to vector<16x1xf32>
    %cst_28 = arith.constant 3.125000e-02 : f32
    %71 = vector.broadcast %cst_28 : f32 to vector<16x1xf32>
    %72 = arith.mulf %70, %71 : vector<16x1xf32>
    %cst_29 = arith.constant 9.99999974E-6 : f32
    %73 = vector.broadcast %cst_29 : f32 to vector<16x1xf32>
    %74 = arith.addf %72, %73 : vector<16x1xf32>
    %75 = math.rsqrt %74 : vector<16x1xf32>
    %76 = vector.broadcast %75 : vector<16x1xf32> to vector<16x128xf32>
    %77 = arith.mulf %67, %76 : vector<16x128xf32>
    %78 = vector.broadcast %25 : vector<1x128xf32> to vector<16x128xf32>
    %79 = arith.mulf %77, %78 : vector<16x128xf32>
    %80 = vector.broadcast %26 : vector<1x128xf32> to vector<16x128xf32>
    %81 = arith.addf %79, %80 : vector<16x128xf32>
    %cst_30 = arith.constant 0.00999999977 : f32
    %82 = vector.broadcast %cst_30 : f32 to vector<16x128xf32>
    %83 = arith.mulf %82, %81 : vector<16x128xf32>
    %84 = arith.maximumf %81, %83 : vector<16x128xf32>
    %c1 = arith.constant 1 : index
    %c0_31 = arith.constant 0 : index
    %c0_32 = arith.constant 0 : index
    %85 = vector.load %arg6[%c1, %c0_31, %c0_32] : memref<5x16x128xf32, #tpu.memory_space<vmem>>, vector<1x16x128xf32>
    %86 = vector.shape_cast %85 : vector<1x16x128xf32> to vector<16x128xf32>
    %87 = vector.shape_cast %84 : vector<16x128xf32> to vector<1x16x128xf32>
    tpu.vector_store %arg6[%c1, %c0_31, %c0_32], %87 {strides = array<i32>} : memref<5x16x128xf32, #tpu.memory_space<vmem>>, vector<1x16x128xf32>,
    %c1_33 = arith.constant 1 : index
    %c0_34 = arith.constant 0 : index
    %c0_35 = arith.constant 0 : index
    %88 = vector.load %arg4[%c1_33, %c0_34, %c0_35] : memref<4x128x128xbf16, #tpu.memory_space<vmem>>, vector<1x128x128xbf16>
    %89 = vector.shape_cast %88 : vector<1x128x128xbf16> to vector<128x128xbf16>
    %c1_36 = arith.constant 1 : index
    %c0_37 = arith.constant 0 : index
    %c0_38 = arith.constant 0 : index
    %90 = vector.load %arg5[%c1_36, %c0_37, %c0_38] : memref<4x5x128xf32, #tpu.memory_space<vmem>>, vector<1x5x128xf32>
    %91 = vector.shape_cast %90 : vector<1x5x128xf32> to vector<5x128xf32>
    %92 = vector.extract_strided_slice %91 {offsets = [0, 0], sizes = [1, 128], strides = [1, 1]} : vector<5x128xf32> to vector<1x128xf32>
    %93 = vector.extract_strided_slice %91 {offsets = [2, 0], sizes = [1, 128], strides = [1, 1]} : vector<5x128xf32> to vector<1x128xf32>
    %94 = vector.extract_strided_slice %91 {offsets = [3, 0], sizes = [1, 128], strides = [1, 1]} : vector<5x128xf32> to vector<1x128xf32>
    %95 = vector.extract_strided_slice %91 {offsets = [4, 0], sizes = [1, 128], strides = [1, 1]} : vector<5x128xf32> to vector<1x128xf32>
    %96 = arith.truncf %84 : vector<16x128xf32> to vector<16x128xbf16>
    %cst_39 = arith.constant dense<0.000000e+00> : vector<16x128xf32>
    %97 = tpu.matmul %96, %89, %cst_39 {dimension_numbers = #tpu.dot_dimension_numbers<[1], [0], [0], [1], [0, 0, 1, 1], [], []>} : vector<16x128xbf16>, vector<128x128xbf16>, vector<16x128xf32> -> vector<16x128xf32>
    %98 = vector.extract_strided_slice %97 {offsets = [0, 32], sizes = [16, 1], strides = [1, 1]} : vector<16x128xf32> to vector<16x1xf32>
    %99 = vector.broadcast %18 : vector<1x128xf32> to vector<16x128xf32>
    %100 = arith.mulf %97, %99 : vector<16x128xf32>
    %101 = arith.truncf %100 : vector<16x128xf32> to vector<16x128xbf16>
    %102 = arith.truncf %92 : vector<1x128xf32> to vector<1x128xbf16>
    %cst_40 = arith.constant dense<0.000000e+00> : vector<1x16xf32>
    %103 = tpu.matmul %102, %101, %cst_40 {dimension_numbers = #tpu.dot_dimension_numbers<[1], [1], [0], [0], [0, 0, 1, 0], [], []>} : vector<1x128xbf16>, vector<16x128xbf16>, vector<1x16xf32> -> vector<1x16xf32>
    %104 = vector.broadcast %98 : vector<16x1xf32> to vector<16x16xf32>
    %105 = vector.broadcast %103 : vector<1x16xf32> to vector<16x16xf32>
    %106 = arith.addf %104, %105 : vector<16x16xf32>
    %cst_41 = arith.constant 2.000000e-01 : f32
    %107 = vector.broadcast %cst_41 : f32 to vector<16x16xf32>
    %108 = arith.mulf %107, %106 : vector<16x16xf32>
    %109 = arith.maximumf %106, %108 : vector<16x16xf32>
    %110 = arith.addf %109, %13 : vector<16x16xf32>
    %cst_42 = arith.constant dense<0xFF800000> : vector<16xf32>
    %111 = vector.multi_reduction <maximumf>, %110, %cst_42 [1] : vector<16x16xf32> to vector<16xf32>
    %112 = vector.shape_cast %111 : vector<16xf32> to vector<16x1xf32>
    %cst_43 = arith.constant -1.000000e+20 : f32
    %113 = vector.broadcast %cst_43 : f32 to vector<16x1xf32>
    %114 = arith.maximumf %112, %113 : vector<16x1xf32>
    %115 = vector.broadcast %114 : vector<16x1xf32> to vector<16x16xf32>
    %116 = arith.subf %110, %115 : vector<16x16xf32>
    %117 = math.exp %116 : vector<16x16xf32>
    %cst_44 = arith.constant dense<0.000000e+00> : vector<16xf32>
    %118 = vector.multi_reduction <add>, %117, %cst_44 [1] : vector<16x16xf32> to vector<16xf32>
    %119 = vector.shape_cast %118 : vector<16xf32> to vector<16x1xf32>
    %cst_45 = arith.constant 1.000000e-16 : f32
    %120 = vector.broadcast %cst_45 : f32 to vector<16x1xf32>
    %121 = arith.maximumf %119, %120 : vector<16x1xf32>
    %122 = tpu.reciprocal %121 {approx = true} : vector<16x1xf32> -> vector<16x1xf32>
    %123 = vector.broadcast %122 : vector<16x1xf32> to vector<16x16xf32>
    %124 = arith.mulf %117, %123 : vector<16x16xf32>
    %125 = arith.truncf %124 : vector<16x16xf32> to vector<16x16xbf16>
    %cst_46 = arith.constant dense<0.000000e+00> : vector<16x128xf32>
    %126 = tpu.matmul %125, %101, %cst_46 {dimension_numbers = #tpu.dot_dimension_numbers<[1], [0], [0], [1], [0, 0, 1, 1], [], []>} : vector<16x16xbf16>, vector<16x128xbf16>, vector<16x128xf32> -> vector<16x128xf32>
    %127 = vector.broadcast %93 : vector<1x128xf32> to vector<16x128xf32>
    %128 = arith.addf %126, %127 : vector<16x128xf32>
    %cst_47 = arith.constant dense<0.000000e+00> : vector<16xf32>
    %129 = vector.multi_reduction <add>, %128, %cst_47 [1] : vector<16x128xf32> to vector<16xf32>
    %130 = vector.shape_cast %129 : vector<16xf32> to vector<16x1xf32>
    %cst_48 = arith.constant 3.125000e-02 : f32
    %131 = vector.broadcast %cst_48 : f32 to vector<16x1xf32>
    %132 = arith.mulf %130, %131 : vector<16x1xf32>
    %133 = vector.broadcast %132 : vector<16x1xf32> to vector<16x128xf32>
    %134 = arith.subf %128, %133 : vector<16x128xf32>
    %135 = vector.broadcast %18 : vector<1x128xf32> to vector<16x128xf32>
    %136 = arith.mulf %134, %135 : vector<16x128xf32>
    %137 = arith.mulf %136, %136 : vector<16x128xf32>
    %cst_49 = arith.constant dense<0.000000e+00> : vector<16xf32>
    %138 = vector.multi_reduction <add>, %137, %cst_49 [1] : vector<16x128xf32> to vector<16xf32>
    %139 = vector.shape_cast %138 : vector<16xf32> to vector<16x1xf32>
    %cst_50 = arith.constant 3.125000e-02 : f32
    %140 = vector.broadcast %cst_50 : f32 to vector<16x1xf32>
    %141 = arith.mulf %139, %140 : vector<16x1xf32>
    %cst_51 = arith.constant 9.99999974E-6 : f32
    %142 = vector.broadcast %cst_51 : f32 to vector<16x1xf32>
    %143 = arith.addf %141, %142 : vector<16x1xf32>
    %144 = math.rsqrt %143 : vector<16x1xf32>
    %145 = vector.broadcast %144 : vector<16x1xf32> to vector<16x128xf32>
    %146 = arith.mulf %136, %145 : vector<16x128xf32>
    %147 = vector.broadcast %94 : vector<1x128xf32> to vector<16x128xf32>
    %148 = arith.mulf %146, %147 : vector<16x128xf32>
    %149 = vector.broadcast %95 : vector<1x128xf32> to vector<16x128xf32>
    %150 = arith.addf %148, %149 : vector<16x128xf32>
    %cst_52 = arith.constant 0.00999999977 : f32
    %151 = vector.broadcast %cst_52 : f32 to vector<16x128xf32>
    %152 = arith.mulf %151, %150 : vector<16x128xf32>
    %153 = arith.maximumf %150, %152 : vector<16x128xf32>
    %c2 = arith.constant 2 : index
    %c0_53 = arith.constant 0 : index
    %c0_54 = arith.constant 0 : index
    %154 = vector.load %arg6[%c2, %c0_53, %c0_54] : memref<5x16x128xf32, #tpu.memory_space<vmem>>, vector<1x16x128xf32>
    %155 = vector.shape_cast %154 : vector<1x16x128xf32> to vector<16x128xf32>
    %156 = vector.shape_cast %153 : vector<16x128xf32> to vector<1x16x128xf32>
    tpu.vector_store %arg6[%c2, %c0_53, %c0_54], %156 {strides = array<i32>} : memref<5x16x128xf32, #tpu.memory_space<vmem>>, vector<1x16x128xf32>,
    %c2_55 = arith.constant 2 : index
    %c0_56 = arith.constant 0 : index
    %c0_57 = arith.constant 0 : index
    %157 = vector.load %arg4[%c2_55, %c0_56, %c0_57] : memref<4x128x128xbf16, #tpu.memory_space<vmem>>, vector<1x128x128xbf16>
    %158 = vector.shape_cast %157 : vector<1x128x128xbf16> to vector<128x128xbf16>
    %c2_58 = arith.constant 2 : index
    %c0_59 = arith.constant 0 : index
    %c0_60 = arith.constant 0 : index
    %159 = vector.load %arg5[%c2_58, %c0_59, %c0_60] : memref<4x5x128xf32, #tpu.memory_space<vmem>>, vector<1x5x128xf32>
    %160 = vector.shape_cast %159 : vector<1x5x128xf32> to vector<5x128xf32>
    %161 = vector.extract_strided_slice %160 {offsets = [0, 0], sizes = [1, 128], strides = [1, 1]} : vector<5x128xf32> to vector<1x128xf32>
    %162 = vector.extract_strided_slice %160 {offsets = [2, 0], sizes = [1, 128], strides = [1, 1]} : vector<5x128xf32> to vector<1x128xf32>
    %163 = vector.extract_strided_slice %160 {offsets = [3, 0], sizes = [1, 128], strides = [1, 1]} : vector<5x128xf32> to vector<1x128xf32>
    %164 = vector.extract_strided_slice %160 {offsets = [4, 0], sizes = [1, 128], strides = [1, 1]} : vector<5x128xf32> to vector<1x128xf32>
    %165 = arith.truncf %153 : vector<16x128xf32> to vector<16x128xbf16>
    %cst_61 = arith.constant dense<0.000000e+00> : vector<16x128xf32>
    %166 = tpu.matmul %165, %158, %cst_61 {dimension_numbers = #tpu.dot_dimension_numbers<[1], [0], [0], [1], [0, 0, 1, 1], [], []>} : vector<16x128xbf16>, vector<128x128xbf16>, vector<16x128xf32> -> vector<16x128xf32>
    %167 = vector.extract_strided_slice %166 {offsets = [0, 32], sizes = [16, 1], strides = [1, 1]} : vector<16x128xf32> to vector<16x1xf32>
    %168 = vector.broadcast %18 : vector<1x128xf32> to vector<16x128xf32>
    %169 = arith.mulf %166, %168 : vector<16x128xf32>
    %170 = arith.truncf %169 : vector<16x128xf32> to vector<16x128xbf16>
    %171 = arith.truncf %161 : vector<1x128xf32> to vector<1x128xbf16>
    %cst_62 = arith.constant dense<0.000000e+00> : vector<1x16xf32>
    %172 = tpu.matmul %171, %170, %cst_62 {dimension_numbers = #tpu.dot_dimension_numbers<[1], [1], [0], [0], [0, 0, 1, 0], [], []>} : vector<1x128xbf16>, vector<16x128xbf16>, vector<1x16xf32> -> vector<1x16xf32>
    %173 = vector.broadcast %167 : vector<16x1xf32> to vector<16x16xf32>
    %174 = vector.broadcast %172 : vector<1x16xf32> to vector<16x16xf32>
    %175 = arith.addf %173, %174 : vector<16x16xf32>
    %cst_63 = arith.constant 2.000000e-01 : f32
    %176 = vector.broadcast %cst_63 : f32 to vector<16x16xf32>
    %177 = arith.mulf %176, %175 : vector<16x16xf32>
    %178 = arith.maximumf %175, %177 : vector<16x16xf32>
    %179 = arith.addf %178, %13 : vector<16x16xf32>
    %cst_64 = arith.constant dense<0xFF800000> : vector<16xf32>
    %180 = vector.multi_reduction <maximumf>, %179, %cst_64 [1] : vector<16x16xf32> to vector<16xf32>
    %181 = vector.shape_cast %180 : vector<16xf32> to vector<16x1xf32>
    %cst_65 = arith.constant -1.000000e+20 : f32
    %182 = vector.broadcast %cst_65 : f32 to vector<16x1xf32>
    %183 = arith.maximumf %181, %182 : vector<16x1xf32>
    %184 = vector.broadcast %183 : vector<16x1xf32> to vector<16x16xf32>
    %185 = arith.subf %179, %184 : vector<16x16xf32>
    %186 = math.exp %185 : vector<16x16xf32>
    %cst_66 = arith.constant dense<0.000000e+00> : vector<16xf32>
    %187 = vector.multi_reduction <add>, %186, %cst_66 [1] : vector<16x16xf32> to vector<16xf32>
    %188 = vector.shape_cast %187 : vector<16xf32> to vector<16x1xf32>
    %cst_67 = arith.constant 1.000000e-16 : f32
    %189 = vector.broadcast %cst_67 : f32 to vector<16x1xf32>
    %190 = arith.maximumf %188, %189 : vector<16x1xf32>
    %191 = tpu.reciprocal %190 {approx = true} : vector<16x1xf32> -> vector<16x1xf32>
    %192 = vector.broadcast %191 : vector<16x1xf32> to vector<16x16xf32>
    %193 = arith.mulf %186, %192 : vector<16x16xf32>
    %194 = arith.truncf %193 : vector<16x16xf32> to vector<16x16xbf16>
    %cst_68 = arith.constant dense<0.000000e+00> : vector<16x128xf32>
    %195 = tpu.matmul %194, %170, %cst_68 {dimension_numbers = #tpu.dot_dimension_numbers<[1], [0], [0], [1], [0, 0, 1, 1], [], []>} : vector<16x16xbf16>, vector<16x128xbf16>, vector<16x128xf32> -> vector<16x128xf32>
    %196 = vector.broadcast %162 : vector<1x128xf32> to vector<16x128xf32>
    %197 = arith.addf %195, %196 : vector<16x128xf32>
    %cst_69 = arith.constant dense<0.000000e+00> : vector<16xf32>
    %198 = vector.multi_reduction <add>, %197, %cst_69 [1] : vector<16x128xf32> to vector<16xf32>
    %199 = vector.shape_cast %198 : vector<16xf32> to vector<16x1xf32>
    %cst_70 = arith.constant 3.125000e-02 : f32
    %200 = vector.broadcast %cst_70 : f32 to vector<16x1xf32>
    %201 = arith.mulf %199, %200 : vector<16x1xf32>
    %202 = vector.broadcast %201 : vector<16x1xf32> to vector<16x128xf32>
    %203 = arith.subf %197, %202 : vector<16x128xf32>
    %204 = vector.broadcast %18 : vector<1x128xf32> to vector<16x128xf32>
    %205 = arith.mulf %203, %204 : vector<16x128xf32>
    %206 = arith.mulf %205, %205 : vector<16x128xf32>
    %cst_71 = arith.constant dense<0.000000e+00> : vector<16xf32>
    %207 = vector.multi_reduction <add>, %206, %cst_71 [1] : vector<16x128xf32> to vector<16xf32>
    %208 = vector.shape_cast %207 : vector<16xf32> to vector<16x1xf32>
    %cst_72 = arith.constant 3.125000e-02 : f32
    %209 = vector.broadcast %cst_72 : f32 to vector<16x1xf32>
    %210 = arith.mulf %208, %209 : vector<16x1xf32>
    %cst_73 = arith.constant 9.99999974E-6 : f32
    %211 = vector.broadcast %cst_73 : f32 to vector<16x1xf32>
    %212 = arith.addf %210, %211 : vector<16x1xf32>
    %213 = math.rsqrt %212 : vector<16x1xf32>
    %214 = vector.broadcast %213 : vector<16x1xf32> to vector<16x128xf32>
    %215 = arith.mulf %205, %214 : vector<16x128xf32>
    %216 = vector.broadcast %163 : vector<1x128xf32> to vector<16x128xf32>
    %217 = arith.mulf %215, %216 : vector<16x128xf32>
    %218 = vector.broadcast %164 : vector<1x128xf32> to vector<16x128xf32>
    %219 = arith.addf %217, %218 : vector<16x128xf32>
    %cst_74 = arith.constant 0.00999999977 : f32
    %220 = vector.broadcast %cst_74 : f32 to vector<16x128xf32>
    %221 = arith.mulf %220, %219 : vector<16x128xf32>
    %222 = arith.maximumf %219, %221 : vector<16x128xf32>
    %c3 = arith.constant 3 : index
    %c0_75 = arith.constant 0 : index
    %c0_76 = arith.constant 0 : index
    %223 = vector.load %arg6[%c3, %c0_75, %c0_76] : memref<5x16x128xf32, #tpu.memory_space<vmem>>, vector<1x16x128xf32>
    %224 = vector.shape_cast %223 : vector<1x16x128xf32> to vector<16x128xf32>
    %225 = vector.shape_cast %222 : vector<16x128xf32> to vector<1x16x128xf32>
    tpu.vector_store %arg6[%c3, %c0_75, %c0_76], %225 {strides = array<i32>} : memref<5x16x128xf32, #tpu.memory_space<vmem>>, vector<1x16x128xf32>,
    %c3_77 = arith.constant 3 : index
    %c0_78 = arith.constant 0 : index
    %c0_79 = arith.constant 0 : index
    %226 = vector.load %arg4[%c3_77, %c0_78, %c0_79] : memref<4x128x128xbf16, #tpu.memory_space<vmem>>, vector<1x128x128xbf16>
    %227 = vector.shape_cast %226 : vector<1x128x128xbf16> to vector<128x128xbf16>
    %c3_80 = arith.constant 3 : index
    %c0_81 = arith.constant 0 : index
    %c0_82 = arith.constant 0 : index
    %228 = vector.load %arg5[%c3_80, %c0_81, %c0_82] : memref<4x5x128xf32, #tpu.memory_space<vmem>>, vector<1x5x128xf32>
    %229 = vector.shape_cast %228 : vector<1x5x128xf32> to vector<5x128xf32>
    %230 = vector.extract_strided_slice %229 {offsets = [0, 0], sizes = [1, 128], strides = [1, 1]} : vector<5x128xf32> to vector<1x128xf32>
    %231 = vector.extract_strided_slice %229 {offsets = [2, 0], sizes = [1, 128], strides = [1, 1]} : vector<5x128xf32> to vector<1x128xf32>
    %232 = vector.extract_strided_slice %229 {offsets = [3, 0], sizes = [1, 128], strides = [1, 1]} : vector<5x128xf32> to vector<1x128xf32>
    %233 = vector.extract_strided_slice %229 {offsets = [4, 0], sizes = [1, 128], strides = [1, 1]} : vector<5x128xf32> to vector<1x128xf32>
    %234 = arith.truncf %222 : vector<16x128xf32> to vector<16x128xbf16>
    %cst_83 = arith.constant dense<0.000000e+00> : vector<16x128xf32>
    %235 = tpu.matmul %234, %227, %cst_83 {dimension_numbers = #tpu.dot_dimension_numbers<[1], [0], [0], [1], [0, 0, 1, 1], [], []>} : vector<16x128xbf16>, vector<128x128xbf16>, vector<16x128xf32> -> vector<16x128xf32>
    %236 = vector.extract_strided_slice %235 {offsets = [0, 32], sizes = [16, 1], strides = [1, 1]} : vector<16x128xf32> to vector<16x1xf32>
    %237 = vector.broadcast %18 : vector<1x128xf32> to vector<16x128xf32>
    %238 = arith.mulf %235, %237 : vector<16x128xf32>
    %239 = arith.truncf %238 : vector<16x128xf32> to vector<16x128xbf16>
    %240 = arith.truncf %230 : vector<1x128xf32> to vector<1x128xbf16>
    %cst_84 = arith.constant dense<0.000000e+00> : vector<1x16xf32>
    %241 = tpu.matmul %240, %239, %cst_84 {dimension_numbers = #tpu.dot_dimension_numbers<[1], [1], [0], [0], [0, 0, 1, 0], [], []>} : vector<1x128xbf16>, vector<16x128xbf16>, vector<1x16xf32> -> vector<1x16xf32>
    %242 = vector.broadcast %236 : vector<16x1xf32> to vector<16x16xf32>
    %243 = vector.broadcast %241 : vector<1x16xf32> to vector<16x16xf32>
    %244 = arith.addf %242, %243 : vector<16x16xf32>
    %cst_85 = arith.constant 2.000000e-01 : f32
    %245 = vector.broadcast %cst_85 : f32 to vector<16x16xf32>
    %246 = arith.mulf %245, %244 : vector<16x16xf32>
    %247 = arith.maximumf %244, %246 : vector<16x16xf32>
    %248 = arith.addf %247, %13 : vector<16x16xf32>
    %cst_86 = arith.constant dense<0xFF800000> : vector<16xf32>
    %249 = vector.multi_reduction <maximumf>, %248, %cst_86 [1] : vector<16x16xf32> to vector<16xf32>
    %250 = vector.shape_cast %249 : vector<16xf32> to vector<16x1xf32>
    %cst_87 = arith.constant -1.000000e+20 : f32
    %251 = vector.broadcast %cst_87 : f32 to vector<16x1xf32>
    %252 = arith.maximumf %250, %251 : vector<16x1xf32>
    %253 = vector.broadcast %252 : vector<16x1xf32> to vector<16x16xf32>
    %254 = arith.subf %248, %253 : vector<16x16xf32>
    %255 = math.exp %254 : vector<16x16xf32>
    %cst_88 = arith.constant dense<0.000000e+00> : vector<16xf32>
    %256 = vector.multi_reduction <add>, %255, %cst_88 [1] : vector<16x16xf32> to vector<16xf32>
    %257 = vector.shape_cast %256 : vector<16xf32> to vector<16x1xf32>
    %cst_89 = arith.constant 1.000000e-16 : f32
    %258 = vector.broadcast %cst_89 : f32 to vector<16x1xf32>
    %259 = arith.maximumf %257, %258 : vector<16x1xf32>
    %260 = tpu.reciprocal %259 {approx = true} : vector<16x1xf32> -> vector<16x1xf32>
    %261 = vector.broadcast %260 : vector<16x1xf32> to vector<16x16xf32>
    %262 = arith.mulf %255, %261 : vector<16x16xf32>
    %263 = arith.truncf %262 : vector<16x16xf32> to vector<16x16xbf16>
    %cst_90 = arith.constant dense<0.000000e+00> : vector<16x128xf32>
    %264 = tpu.matmul %263, %239, %cst_90 {dimension_numbers = #tpu.dot_dimension_numbers<[1], [0], [0], [1], [0, 0, 1, 1], [], []>} : vector<16x16xbf16>, vector<16x128xbf16>, vector<16x128xf32> -> vector<16x128xf32>
    %265 = vector.broadcast %231 : vector<1x128xf32> to vector<16x128xf32>
    %266 = arith.addf %264, %265 : vector<16x128xf32>
    %cst_91 = arith.constant dense<0.000000e+00> : vector<16xf32>
    %267 = vector.multi_reduction <add>, %266, %cst_91 [1] : vector<16x128xf32> to vector<16xf32>
    %268 = vector.shape_cast %267 : vector<16xf32> to vector<16x1xf32>
    %cst_92 = arith.constant 3.125000e-02 : f32
    %269 = vector.broadcast %cst_92 : f32 to vector<16x1xf32>
    %270 = arith.mulf %268, %269 : vector<16x1xf32>
    %271 = vector.broadcast %270 : vector<16x1xf32> to vector<16x128xf32>
    %272 = arith.subf %266, %271 : vector<16x128xf32>
    %273 = vector.broadcast %18 : vector<1x128xf32> to vector<16x128xf32>
    %274 = arith.mulf %272, %273 : vector<16x128xf32>
    %275 = arith.mulf %274, %274 : vector<16x128xf32>
    %cst_93 = arith.constant dense<0.000000e+00> : vector<16xf32>
    %276 = vector.multi_reduction <add>, %275, %cst_93 [1] : vector<16x128xf32> to vector<16xf32>
    %277 = vector.shape_cast %276 : vector<16xf32> to vector<16x1xf32>
    %cst_94 = arith.constant 3.125000e-02 : f32
    %278 = vector.broadcast %cst_94 : f32 to vector<16x1xf32>
    %279 = arith.mulf %277, %278 : vector<16x1xf32>
    %cst_95 = arith.constant 9.99999974E-6 : f32
    %280 = vector.broadcast %cst_95 : f32 to vector<16x1xf32>
    %281 = arith.addf %279, %280 : vector<16x1xf32>
    %282 = math.rsqrt %281 : vector<16x1xf32>
    %283 = vector.broadcast %282 : vector<16x1xf32> to vector<16x128xf32>
    %284 = arith.mulf %274, %283 : vector<16x128xf32>
    %285 = vector.broadcast %232 : vector<1x128xf32> to vector<16x128xf32>
    %286 = arith.mulf %284, %285 : vector<16x128xf32>
    %287 = vector.broadcast %233 : vector<1x128xf32> to vector<16x128xf32>
    %288 = arith.addf %286, %287 : vector<16x128xf32>
    %cst_96 = arith.constant 0.00999999977 : f32
    %289 = vector.broadcast %cst_96 : f32 to vector<16x128xf32>
    %290 = arith.mulf %289, %288 : vector<16x128xf32>
    %291 = arith.maximumf %288, %290 : vector<16x128xf32>
    %c4 = arith.constant 4 : index
    %c0_97 = arith.constant 0 : index
    %c0_98 = arith.constant 0 : index
    %292 = vector.load %arg6[%c4, %c0_97, %c0_98] : memref<5x16x128xf32, #tpu.memory_space<vmem>>, vector<1x16x128xf32>
    %293 = vector.shape_cast %292 : vector<1x16x128xf32> to vector<16x128xf32>
    %294 = vector.shape_cast %291 : vector<16x128xf32> to vector<1x16x128xf32>
    tpu.vector_store %arg6[%c4, %c0_97, %c0_98], %294 {strides = array<i32>} : memref<5x16x128xf32, #tpu.memory_space<vmem>>, vector<1x16x128xf32>,
    return
  }
}

</mosaic_0001>

<bundles_post_ra>
// kernel: _fused_forward.1
= control target key start
LH: loop header
LB: loop body
LE: loop exit
PB: predicated region body
PF: predicated region fallthrough
CT: control target
= control target key end

     0   :  { %11 = vsyncpa [#allocation3], 0  ;;  %s2098_s0 = inlined_call_operand.vmem [shape: bf16[16,128], index: 0, kind: input, shape index: {}]   ;;  %s2099_s1 = inlined_call_operand.vmem [shape: bf16[16,16], index: 1, kind: input, shape index: {}]   ;;  %s2100_s2 = inlined_call_operand.hbm [shape: bf16[128,128], index: 2, kind: input, shape index: {}]   ;;  %s2101_s3 = inlined_call_operand.vmem [shape: f32[1,128], index: 3, kind: input, shape index: {}]   ;;  %s2102_s4 = inlined_call_operand.hbm [shape: bf16[4,128,128], index: 4, kind: input, shape index: {}]   ;;  %s2103_s5 = inlined_call_operand.vmem [shape: f32[4,5,128], index: 5, kind: input, shape index: {}]   ;;  %s2104_s6 = inlined_call_operand.hbm [shape: f32[5,16,128], index: 6, kind: output, shape index: {}]  }
   0x1   :  { %12 = vsyncpa [#allocation6], 0 }
   0x2   :  { %13 = vsyncpa [#allocation4], 0  ;;  %s1813_s21 = smov [#allocation2]   ;;  %s1741_s25 = scalar_lea.hbm %s2100_s2, 1024 }
   0x3   :  { %s23_s22 = sshll.u32 %s1813_s21, 4  ;;  %p1742_p0 = scmp.ne.s32.totalorder %s2100_s2, %s1741_s25  ;;  %s24_s22 = int_to_ptr.vmem [resolvable:$true] %s23_s22 }
   0x4   :  { %p1745_p1 = scmp.lt.u32.totalorder %s1741_s25, %s2100_s2 }
   0x6   :  { %p1747_p2 = pnand %p1745_p1, %p1742_p0 }
   0x8   :  { %1750 = shalt.err (!%p1747_p2)
}
   0x9   :  { %s1751_s30 = scalar_lea.vmem %s24_s22, 1024  ;;  %p1756_p4 = scmp.lt.s32.totalorder %s24_s22, %s24_s22 }
   0xa   :  { %p1752_p3 = scmp.ne.s32.totalorder %s24_s22, %s1751_s30  ;;  %p1757_p5 = scmp.lt.s32.totalorder %s1751_s30, %s1751_s30 }
   0xc   :  { %p1758_p6 = por %p1757_p5, %p1756_p4 }
   0xe   :  { %p1759_p7 = pnand %p1758_p6, %p1752_p3 }
  0x10   :  { %1762 = shalt.err (!%p1759_p7)
}
  0x11   :  { %s1814_s7 = smov 64   ;;  %s1815_s8 = smov 4  }
  0x12   :  { %29 = dma.hbm_to_vmem [thread:$0]  %s2100_s2, 1024, %s24_s22, [#allocation3], %s1814_s7, %s1814_s7, %s1815_s8  }
  0x13   :  { %s1816_s11 = smov [#allocation5]   ;;  %s1763_s15 = scalar_lea.hbm %s2102_s4, 4096 }
  0x14   :  { %s37_s12 = sshll.u32 %s1816_s11, 4  ;;  %p1764_p8 = scmp.ne.s32.totalorder %s2102_s4, %s1763_s15  ;;  %s38_s12 = int_to_ptr.vmem [resolvable:$true] %s37_s12 }
  0x15   :  { %p1767_p9 = scmp.lt.u32.totalorder %s1763_s15, %s2102_s4 }
  0x17   :  { %p1769_p10 = pnand %p1767_p9, %p1764_p8 }
  0x19   :  { %1772 = shalt.err (!%p1769_p10)
}
  0x1a   :  { %s1773_s20 = scalar_lea.vmem %s38_s12, 4096  ;;  %p1778_p12 = scmp.lt.s32.totalorder %s38_s12, %s38_s12 }
  0x1b   :  { %p1774_p11 = scmp.ne.s32.totalorder %s38_s12, %s1773_s20  ;;  %p1779_p13 = scmp.lt.s32.totalorder %s1773_s20, %s1773_s20 }
  0x1d   :  { %p1780_p0 = por %p1779_p13, %p1778_p12 }
  0x1f   :  { %p1781_p1 = pnand %p1780_p0, %p1774_p11 }
  0x21   :  { %1784 = shalt.err (!%p1781_p1)
}
  0x22   :  { %43 = dma.hbm_to_vmem [thread:$0]  %s2102_s4, 4096, %s38_s12, [#allocation6], %s1814_s7, %s1814_s7, %s1815_s8  }
  0x23   :  { %1807 = dma.done.wait [#allocation3], 1024  }
  0x24   :  { %1808 = vsyncadd [#allocation3], 4294966272 }
  0x25   :  { %1809 = dma.done.wait [#allocation6], 4096  }
  0x26   :  { %1810 = vsyncadd [#allocation6], 4294963200  ;;  %v1817_v0 = vmov 0.0   ;;  %vm1818_vm0 = vmmov 0   ;;  %v1652_v1 = vld [vmem:[#allocation2] sm:$0xff]   ;;  %v1653_v2 = vld [vmem:[#allocation2 + $0x8] sm:$0xff]   ;;  %v183_v31 = vlaneseq }
  0x27   :  { %1492 = vmatprep.subr.bf16.mxu0 %v1817_v0  ;;  %1508 = vmatprep.mubr.msk.bf16.mxu0 %vm1818_vm0, %v1817_v0  ;;  %v1654_v3 = vld [vmem:[#allocation2 + $0x10] sm:$0xff]   ;;  %v1661_v4 = vld [vmem:[#allocation5] sm:$0xff]   ;;  %v1655_v5 = vld [vmem:[#allocation2 + $0x18] sm:$0xff]   ;;  %v1819_v18 = vmov 32   ;;  %vm361_vm2 = vcmask 130048  }
  0x28   :  { %1512 = vmatprep.subr.bf16.mxu1 %v1817_v0  ;;  %1528 = vmatprep.mubr.msk.bf16.mxu1 %vm1818_vm0, %v1817_v0  ;;  %v1662_v6 = vld [vmem:[#allocation5 + $0x8] sm:$0xff]   ;;  %v1656_v7 = vld [vmem:[#allocation2 + $0x20] sm:$0xff]   ;;  %v1663_v8 = vld [vmem:[#allocation5 + $0x10] sm:$0xff]   ;;  %v184_v32 = vand.u32 127, %v183_v31  ;;  %v1930_v43 = vshrl.u32 %v183_v31, 7 }
  0x29   :  { %1493 = vmatpush3.bf16.msra.mxu0 %v1652_v1  ;;  %1513 = vmatpush3.bf16.msra.mxu1 %v1661_v4  ;;  %v1657_v9 = vld [vmem:[#allocation2 + $0x28] sm:$0xff]   ;;  %v1664_v10 = vld [vmem:[#allocation5 + $0x18] sm:$0xff]   ;;  %v1658_v11 = vld [vmem:[#allocation2 + $0x30] sm:$0xff]  }
  0x2a   :  { %1494 = vmatprep.subr.bf16.mxu0 %v1817_v0  ;;  %1514 = vmatprep.subr.bf16.mxu1 %v1817_v0  ;;  %v1665_v12 = vld [vmem:[#allocation5 + $0x20] sm:$0xff]   ;;  %v1659_v13 = vld [vmem:[#allocation2 + $0x38] sm:$0xff]   ;;  %v1666_v15 = vld [vmem:[#allocation5 + $0x28] sm:$0xff]   ;;  %vm185_vm1 = vcmp.lt.s32.totalorder %v184_v32, 32  ;;  %v1933_v45 = vsub.s32 0, %v1930_v43 }
  0x2b   :  { %v1660_v14 = vld [vmem:[%s2098_s0] sm:$0xff]   ;;  %v1667_v16 = vld [vmem:[#allocation5 + $0x30] sm:$0xff]   ;;  %v1668_v17 = vld [vmem:[#allocation5 + $0x38] sm:$0xff]   ;;  %1650 = vset.pattern.permute.xlu0 %v1819_v18  ;;  %1651 = vset.pattern.permute.xlu1 %v1819_v18  ;;  %v1915_v33 = vsel %vm185_vm1, 1.0, %v1817_v0 }
  0x2c   :  { %v1377_v19 = vld [vmem:[%s2101_s3] ss:$0 sm:$0xff] }
  0x2d   :  { %1495 = vmatpush3.bf16.msra.mxu0 %v1653_v2  ;;  %1515 = vmatpush3.bf16.msra.mxu1 %v1662_v6  ;;  %v1922_v41 = vld [vmem:[%s2103_s5] sm:$0x1f] }
  0x2e   :  { %1496 = vmatprep.subr.bf16.mxu0 %v1817_v0  ;;  %1516 = vmatprep.subr.bf16.mxu1 %v1817_v0  ;;  %v298_v42 = vpack.c.bf16 %v1922_v41, %v1922_v41  ;;  %v1428_v51 = vld [vmem:[%s2099_s1] sm:$0xff]  }
  0x2f   :  { %v1939_v57 = vunpack.c.l.bf16 %v1428_v51  ;;  %v1941_v59 = vunpack.c.h.bf16 %v1428_v51  ;;  %v1675_v51 = vld [vmem:[#allocation5 + $0x70] sm:$0xff]  }
  0x31   :  { %1497 = vmatpush3.bf16.msra.mxu0 %v1654_v3  ;;  %1517 = vmatpush3.bf16.msra.mxu1 %v1663_v8 }
  0x32   :  { %1498 = vmatprep.subr.bf16.mxu0 %v1817_v0  ;;  %1518 = vmatprep.subr.bf16.mxu1 %v1817_v0 }
  0x35   :  { %1499 = vmatpush3.bf16.msra.mxu0 %v1655_v5  ;;  %1519 = vmatpush3.bf16.msra.mxu1 %v1664_v10 }
  0x36   :  { %1500 = vmatprep.subr.bf16.mxu0 %v1817_v0  ;;  %1520 = vmatprep.subr.bf16.mxu1 %v1817_v0 }
  0x39   :  { %1501 = vmatpush3.bf16.msra.mxu0 %v1656_v7  ;;  %1521 = vmatpush3.bf16.msra.mxu1 %v1665_v12 }
  0x3a   :  { %1502 = vmatprep.subr.bf16.mxu0 %v1817_v0  ;;  %1522 = vmatprep.subr.bf16.mxu1 %v1817_v0 }
  0x3d   :  { %1503 = vmatpush3.bf16.msra.mxu0 %v1657_v9  ;;  %1523 = vmatpush3.bf16.msra.mxu1 %v1666_v15 }
  0x3e   :  { %1504 = vmatprep.subr.bf16.mxu0 %v1817_v0  ;;  %1524 = vmatprep.subr.bf16.mxu1 %v1817_v0 }
  0x41   :  { %1505 = vmatpush3.bf16.msra.mxu0 %v1658_v11  ;;  %1525 = vmatpush3.bf16.msra.mxu1 %v1667_v16 }
  0x42   :  { %1506 = vmatprep.subr.bf16.mxu0 %v1817_v0  ;;  %1526 = vmatprep.subr.bf16.mxu1 %v1817_v0 }
  0x45   :  { %1507 = vmatpush3.bf16.msra.mxu0 %v1659_v13  ;;  %1527 = vmatpush3.bf16.msra.mxu1 %v1668_v17 }
  0x46   :  { %1544 = vmatprep.subr.bf16.mxu0 %v1817_v0  ;;  %1532 = vmatprep.subr.bf16.mxu1 %v1817_v0 }
  0x48   :  { %1509 = vmatmul.mubr.bf16.vlgmr.msra.gmra.mrb[0].mxu0 %v1660_v14 }
  0x49   :  { %1560 = vmatprep.mubr.msk.bf16.mxu0 %vm1818_vm0, %v1817_v0 }
 0x11b   :  { %v166_v20 = vpop.f32.mrb[0].mxu0 }
 0x11c   :  { %v167_v21 = vadd.f32 %v1377_v19, %v166_v20  ;;  %v1510_v22 = vpop.f32.mrb[1].mxu0 }
 0x11d   :  { %v169_v23 = vpop.f32.mrb[2].mxu0 }
 0x11e   :  { %v173_v24 = vmul.f32 0.01, %v167_v21  ;;  %v170_v25 = vadd.f32 %v1377_v19, %v169_v23  ;;  %v1511_v26 = vpop.f32.mrb[3].mxu0  ;;  %v1953_v23 = vsub.s32 2, %v1930_v43 }
 0x120   :  { %v175_v27 = vmax.f32 %v167_v21, %v173_v24  ;;  %v174_v28 = vmul.f32 0.01, %v170_v25  ;;  %v392_v24 = vrot.slane %v1922_v41, %v1953_v23 }
 0x122   :  { %177 = vst [vmem:[#allocation7] sm:$0xff] %v175_v27  ;;  %v176_v29 = vmax.f32 %v170_v25, %v174_v28 }
 0x124   :  { %178 = vst [vmem:[#allocation7 + $0x8] sm:$0xff] %v176_v29  ;;  %v205_v30 = vpack.c.bf16 %v176_v29, %v175_v27 }
 0x126   :  { %1529 = vmatmul.mubr.bf16.vlgmr.msra.gmra.mrb[0].mxu1 %v205_v30 }
 0x127   :  { %1534 = vmatprep.mubr.msk.bf16.mxu1 %vm1818_vm0, %v1817_v0 }
 0x1f9   :  { %v288_v34 = vpop.f32.mrb[0].mxu1 }
 0x1fa   :  { %341 = vperm.xlu0 %1650, %v288_v34   ;;  %v1530_v35 = vpop.f32.mrb[1].mxu1  ;;  %v295_v37 = vmul.f32 %v1915_v33, %v288_v34 }
 0x1fb   :  { %v291_v36 = vpop.f32.mrb[2].mxu1 }
 0x1fc   :  { %v296_v38 = vmul.f32 %v1915_v33, %v291_v36  ;;  %v1531_v39 = vpop.f32.mrb[3].mxu1 }
 0x1fe   :  { %v297_v40 = vpack.c.bf16 %v296_v38, %v295_v37  ;;  %346 = vperm.xlu0 %1650, %v291_v36  }
 0x200   :  { %1533 = vmatpush3.bf16.xpose.msra.mxu1 %v297_v40 }
 0x201   :  { %1538 = vmatprep.subr.bf16.mxu1 %v1817_v0 }
 0x207   :  { %1535 = vmatmul.mubr.bf16.vlgmr.msra.gmra.mrb[4].mxu1 %v298_v42 }
 0x208   :  { %1539 = vmatpush3.bf16.msra.mxu1 %v297_v40  ;;  %1540 = vmatprep.mubr.msk.bf16.mxu1 %vm1818_vm0, %v1817_v0 }
 0x209   :  { %1564 = vmatprep.subr.bf16.mxu1 %v1817_v0 }
 0x279   :  { %v342_v44 = vpop.permute.xlu0 %341 }
 0x27d   :  { %v347_v49 = vpop.permute.xlu0 %346 }
 0x2da   :  { %v333_v46 = vpop.f32.mrb[4].mxu1 }
 0x2db   :  { %v352_v47 = vrot.slane %v333_v46, %v1933_v45  ;;  %v1536_v48 = vpop.f32.mrb[5].mxu1  ;;  %v1670_v46 = vld [vmem:[#allocation5 + $0x48] sm:$0xff]  }
 0x2dc   :  { %v336_v50 = vpop.f32.mrb[6].mxu1  ;;  %v1672_v48 = vld [vmem:[#allocation5 + $0x58] sm:$0xff]  }
 0x2dd   :  { %v353_v52 = vadd.f32 %v352_v47, %v342_v44  ;;  %v354_v53 = vadd.f32 %v352_v47, %v347_v49  ;;  %v1537_v54 = vpop.f32.mrb[7].mxu1  ;;  %v1669_v44 = vld [vmem:[#allocation5 + $0x40] sm:$0xff]   ;;  %v1671_v47 = vld [vmem:[#allocation5 + $0x50] sm:$0xff]   ;;  %v1674_v50 = vld [vmem:[#allocation5 + $0x68] sm:$0xff]  }
 0x2de   :  { %1545 = vmatpush3.bf16.msra.mxu0 %v1669_v44  ;;  %v1673_v49 = vld [vmem:[#allocation5 + $0x60] sm:$0xff]  }
 0x2df   :  { %v355_v55 = vmul.f32 0.2, %v353_v52  ;;  %v356_v56 = vmul.f32 0.2, %v354_v53  ;;  %1546 = vmatprep.subr.bf16.mxu0 %v1817_v0 }
 0x2e1   :  { %v357_v58 = vmax.f32 %v353_v52, %v355_v55  ;;  %v358_v60 = vmax.f32 %v354_v53, %v356_v56  ;;  %v1676_v52 = vld [vmem:[#allocation5 + $0x78] sm:$0xff]  }
 0x2e2   :  { %1547 = vmatpush3.bf16.msra.mxu0 %v1670_v46 }
 0x2e3   :  { %v359_v61 = vadd.f32 %v1939_v57, %v357_v58  ;;  %v360_v63 = vadd.f32 %v1941_v59, %v358_v60  ;;  %1548 = vmatprep.subr.bf16.mxu0 %v1817_v0 }
 0x2e5   :  { %v362_v62 = vsel %vm361_vm2, %v359_v61, -inf  ;;  %v365_v1 = vsel %vm361_vm2, %v360_v63, -inf }
 0x2e6   :  { %363 = vmax.xlane.f32.xlu1 %v362_v62  ;;  %1549 = vmatpush3.bf16.msra.mxu0 %v1671_v47  ;;  %v1971_v62 = vsub.s32 4, %v1930_v43 }
 0x2e7   :  { %1550 = vmatprep.subr.bf16.mxu0 %v1817_v0 }
 0x2ea   :  { %366 = vmax.xlane.f32.xlu1 %v365_v1  ;;  %1551 = vmatpush3.bf16.msra.mxu0 %v1672_v48 }
 0x2eb   :  { %1552 = vmatprep.subr.bf16.mxu0 %v1817_v0 }
 0x2ee   :  { %1553 = vmatpush3.bf16.msra.mxu0 %v1673_v49 }
 0x2ef   :  { %1554 = vmatprep.subr.bf16.mxu0 %v1817_v0 }
 0x2f2   :  { %1555 = vmatpush3.bf16.msra.mxu0 %v1674_v50 }
 0x2f3   :  { %1556 = vmatprep.subr.bf16.mxu0 %v1817_v0 }
 0x2f6   :  { %1557 = vmatpush3.bf16.msra.mxu0 %v1675_v51 }
 0x2f7   :  { %1558 = vmatprep.subr.bf16.mxu0 %v1817_v0 }
 0x2fa   :  { %1559 = vmatpush3.bf16.msra.mxu0 %v1676_v52 }
 0x2fb   :  { %1596 = vmatprep.subr.bf16.mxu0 %v1817_v0 }
 0x373   :  { %v364_v2 = vpop.xlane.xlu1 %363 }
 0x374   :  { %v368_v3 = vmax.f32 %v364_v2, -1e+20 }
 0x376   :  { %v370_v4 = vsub.f32 %v359_v61, %v368_v3  ;;  %v1968_v61 = vsub.s32 3, %v1930_v43  ;;  %v470_v3 = vrot.slane %v1922_v41, %v1971_v62 }
 0x377   :  { %v367_v5 = vpop.xlane.xlu1 %366 }
 0x378   :  { %v372_v6 = vmul.f32 1.442695, %v370_v4  ;;  %v369_v7 = vmax.f32 %v367_v5, -1e+20 }
 0x37a   :  { %1693 = vpow2.f32 %v372_v6  ;;  %v371_v8 = vsub.f32 %v360_v63, %v369_v7  ;;  %v464_v63 = vrot.slane %v1922_v41, %v1968_v61 }
 0x37c   :  { %v374_v9 = vmul.f32 1.442695, %v371_v8 }
 0x37e   :  { %1695 = vpow2.f32 %v374_v9 }
 0x384   :  { %v1694_v10 = vpop.eup %1693 }
 0x385   :  { %v376_v11 = vsel %vm361_vm2, %v1694_v10, 0.0 }
 0x386   :  { %377 = vadd.xlane.f32.xlu0 %v376_v11 }
 0x388   :  { %v1696_v12 = vpop.eup %1695 }
 0x389   :  { %v379_v13 = vsel %vm361_vm2, %v1696_v12, 0.0 }
 0x38a   :  { %380 = vadd.xlane.f32.xlu1 %v379_v13 }
 0x413   :  { %v378_v14 = vpop.xlane.xlu0 %377 }
 0x414   :  { %v382_v15 = vmax.f32 %v378_v14, 1e-16 }
 0x416   :  { %1697 = vrcp.f32 %v382_v15 }
 0x417   :  { %v381_v16 = vpop.xlane.xlu1 %380 }
 0x418   :  { %v383_v17 = vmax.f32 %v381_v16, 1e-16 }
 0x41a   :  { %1699 = vrcp.f32 %v383_v17 }
 0x420   :  { %v1698_v18 = vpop.eup %1697 }
 0x421   :  { %v386_v20 = vmul.f32 %v1698_v18, %v1694_v10 }
 0x424   :  { %v1700_v19 = vpop.eup %1699 }
 0x425   :  { %v387_v21 = vmul.f32 %v1700_v19, %v1696_v12 }
 0x427   :  { %v388_v22 = vpack.c.bf16 %v387_v21, %v386_v20  ;;  %v1984_v20 = vld [vmem:[%s2103_s5 + $0x8] sm:$0x1f] }
 0x428   :  { %v592_v21 = vpack.c.bf16 %v1984_v20, %v1984_v20 }
 0x429   :  { %1541 = vmatmul.mubr.msk.bf16.vlgmr.msra.gmra.mrb[8].mxu1 %vm361_vm2, %v388_v22 }
 0x42a   :  { %1566 = vmatprep.mubr.msk.bf16.mxu1 %vm1818_vm0, %v1817_v0 }
 0x4fc   :  { %v430_v25 = vpop.f32.mrb[8].mxu1 }
 0x4fd   :  { %v431_v26 = vadd.f32 %v430_v25, %v392_v24  ;;  %v1542_v27 = vpop.f32.mrb[9].mxu1 }
 0x4fe   :  { %v433_v28 = vpop.f32.mrb[10].mxu1 }
 0x4ff   :  { %437 = vadd.xlane.f32.xlu1 %v431_v26  ;;  %v1543_v29 = vpop.f32.mrb[11].mxu1  ;;  %v434_v30 = vadd.f32 %v433_v28, %v392_v24 }
 0x503   :  { %439 = vadd.xlane.f32.xlu1 %v434_v30 }
 0x58c   :  { %v438_v31 = vpop.xlane.xlu1 %437 }
 0x58d   :  { %v441_v32 = vmul.f32 0.03125, %v438_v31 }
 0x58f   :  { %v443_v34 = vsub.f32 %v431_v26, %v441_v32 }
 0x590   :  { %v440_v35 = vpop.xlane.xlu1 %439 }
 0x591   :  { %v442_v36 = vmul.f32 0.03125, %v440_v35  ;;  %v445_v37 = vmul.f32 %v1915_v33, %v443_v34 }
 0x593   :  { %v444_v38 = vsub.f32 %v434_v30, %v442_v36  ;;  %v447_v39 = vmul.f32 %v445_v37, %v445_v37 }
 0x595   :  { %449 = vadd.xlane.f32.xlu1 %v447_v39  ;;  %v446_v40 = vmul.f32 %v1915_v33, %v444_v38 }
 0x597   :  { %v448_v42 = vmul.f32 %v446_v40, %v446_v40 }
 0x599   :  { %451 = vadd.xlane.f32.xlu1 %v448_v42 }
 0x622   :  { %v450_v53 = vpop.xlane.xlu1 %449 }
 0x623   :  { %v453_v54 = vmul.f32 0.03125, %v450_v53 }
 0x625   :  { %v455_v55 = vadd.f32 1e-05, %v453_v54 }
 0x626   :  { %v452_v56 = vpop.xlane.xlu1 %451 }
 0x627   :  { %1701 = vrsqrt.f32 %v455_v55  ;;  %v454_v58 = vmul.f32 0.03125, %v452_v56 }
 0x629   :  { %v456_v60 = vadd.f32 1e-05, %v454_v58 }
 0x62b   :  { %1703 = vrsqrt.f32 %v456_v60 }
 0x631   :  { %v1702_v1 = vpop.eup %1701 }
 0x632   :  { %v459_v2 = vmul.f32 %v1702_v1, %v445_v37 }
 0x634   :  { %v465_v4 = vmul.f32 %v464_v63, %v459_v2 }
 0x635   :  { %v1704_v5 = vpop.eup %1703 }
 0x636   :  { %v460_v6 = vmul.f32 %v1704_v5, %v446_v40  ;;  %v471_v7 = vadd.f32 %v470_v3, %v465_v4 }
 0x638   :  { %v466_v8 = vmul.f32 %v464_v63, %v460_v6  ;;  %v473_v9 = vmul.f32 0.01, %v471_v7  ;;  %v685_v6 = vrot.slane %v1984_v20, %v1953_v23 }
 0x63a   :  { %v472_v10 = vadd.f32 %v470_v3, %v466_v8  ;;  %v475_v11 = vmax.f32 %v471_v7, %v473_v9 }
 0x63c   :  { %v474_v12 = vmul.f32 0.01, %v472_v10  ;;  %478 = vst [vmem:[#allocation7 + $0x10] sm:$0xff] %v475_v11 }
 0x63e   :  { %v476_v43 = vmax.f32 %v472_v10, %v474_v12 }
 0x640   :  { %479 = vst [vmem:[#allocation7 + $0x18] sm:$0xff] %v476_v43  ;;  %v499_v13 = vpack.c.bf16 %v476_v43, %v475_v11  ;;  %v1677_v43 = vld [vmem:[#allocation5 + $0x80] sm:$0xff]  }
 0x642   :  { %1561 = vmatmul.mubr.bf16.vlgmr.msra.gmra.mrb[4].mxu0 %v499_v13 }
 0x643   :  { %1598 = vmatprep.mubr.msk.bf16.mxu0 %vm1818_vm0, %v1817_v0 }
 0x715   :  { %v582_v14 = vpop.f32.mrb[4].mxu0 }
 0x716   :  { %635 = vperm.xlu1 %1651, %v582_v14   ;;  %v1562_v41 = vpop.f32.mrb[5].mxu0  ;;  %v589_v16 = vmul.f32 %v1915_v33, %v582_v14 }
 0x717   :  { %v585_v15 = vpop.f32.mrb[6].mxu0 }
 0x718   :  { %v590_v17 = vmul.f32 %v1915_v33, %v585_v15  ;;  %640 = vperm.xlu0 %1650, %v585_v15   ;;  %v1563_v18 = vpop.f32.mrb[7].mxu0 }
 0x71a   :  { %v591_v19 = vpack.c.bf16 %v590_v17, %v589_v16 }
 0x71c   :  { %1565 = vmatpush3.bf16.xpose.msra.mxu1 %v591_v19 }
 0x71d   :  { %1570 = vmatprep.subr.bf16.mxu1 %v1817_v0 }
 0x723   :  { %1567 = vmatmul.mubr.bf16.vlgmr.msra.gmra.mrb[12].mxu1 %v592_v21 }
 0x724   :  { %1571 = vmatpush3.bf16.msra.mxu1 %v591_v19  ;;  %1572 = vmatprep.mubr.msk.bf16.mxu1 %vm1818_vm0, %v1817_v0 }
 0x725   :  { %1576 = vmatprep.subr.bf16.mxu1 %v1817_v0 }
 0x795   :  { %v636_v24 = vpop.permute.xlu1 %635 }
 0x797   :  { %v641_v27 = vpop.permute.xlu0 %640 }
 0x7f6   :  { %v627_v22 = vpop.f32.mrb[12].mxu1 }
 0x7f7   :  { %v646_v25 = vrot.slane %v627_v22, %v1933_v45  ;;  %v1568_v26 = vpop.f32.mrb[13].mxu1 }
 0x7f8   :  { %v630_v28 = vpop.f32.mrb[14].mxu1  ;;  %v1680_v26 = vld [vmem:[#allocation5 + $0x98] sm:$0xff]  }
 0x7f9   :  { %v647_v29 = vadd.f32 %v646_v25, %v636_v24  ;;  %v648_v30 = vadd.f32 %v646_v25, %v641_v27  ;;  %v1569_v31 = vpop.f32.mrb[15].mxu1  ;;  %v1678_v24 = vld [vmem:[#allocation5 + $0x88] sm:$0xff]   ;;  %v1679_v25 = vld [vmem:[#allocation5 + $0x90] sm:$0xff]   ;;  %v1681_v27 = vld [vmem:[#allocation5 + $0xa0] sm:$0xff]  }
 0x7fa   :  { %v1682_v28 = vld [vmem:[#allocation5 + $0xa8] sm:$0xff]  }
 0x7fb   :  { %v649_v32 = vmul.f32 0.2, %v647_v29  ;;  %v650_v34 = vmul.f32 0.2, %v648_v30 }
 0x7fd   :  { %v652_v35 = vmax.f32 %v648_v30, %v650_v34  ;;  %v651_v36 = vmax.f32 %v647_v29, %v649_v32  ;;  %v1683_v29 = vld [vmem:[#allocation5 + $0xb0] sm:$0xff]   ;;  %v1684_v30 = vld [vmem:[#allocation5 + $0xb8] sm:$0xff]  }
 0x7ff   :  { %v654_v37 = vadd.f32 %v1941_v59, %v652_v35  ;;  %v653_v38 = vadd.f32 %v1939_v57, %v651_v36 }
 0x801   :  { %v658_v39 = vsel %vm361_vm2, %v654_v37, -inf  ;;  %v655_v40 = vsel %vm361_vm2, %v653_v38, -inf }
 0x802   :  { %659 = vmax.xlane.f32.xlu0 %v658_v39  ;;  %656 = vmax.xlane.f32.xlu1 %v655_v40 }
 0x88f   :  { %v660_v42 = vpop.xlane.xlu0 %659  ;;  %v657_v44 = vpop.xlane.xlu1 %656 }
 0x890   :  { %v662_v46 = vmax.f32 %v660_v42, -1e+20  ;;  %v661_v47 = vmax.f32 %v657_v44, -1e+20  ;;  %v763_v42 = vrot.slane %v1984_v20, %v1971_v62 }
 0x892   :  { %v664_v48 = vsub.f32 %v654_v37, %v662_v46  ;;  %v663_v49 = vsub.f32 %v653_v38, %v661_v47  ;;  %v757_v38 = vrot.slane %v1984_v20, %v1968_v61 }
 0x894   :  { %v665_v50 = vmul.f32 1.442695, %v663_v49  ;;  %v667_v51 = vmul.f32 1.442695, %v664_v48 }
 0x896   :  { %1705 = vpow2.f32 %v665_v50 }
 0x897   :  { %1707 = vpow2.f32 %v667_v51 }
 0x8a0   :  { %v1706_v52 = vpop.eup %1705 }
 0x8a1   :  { %v669_v53 = vsel %vm361_vm2, %v1706_v52, 0.0  ;;  %v1708_v54 = vpop.eup %1707 }
 0x8a2   :  { %670 = vadd.xlane.f32.xlu1 %v669_v53  ;;  %v672_v55 = vsel %vm361_vm2, %v1708_v54, 0.0 }
 0x8a6   :  { %673 = vadd.xlane.f32.xlu1 %v672_v55 }
 0x92f   :  { %v671_v56 = vpop.xlane.xlu1 %670 }
 0x930   :  { %v675_v58 = vmax.f32 %v671_v56, 1e-16 }
 0x932   :  { %1709 = vrcp.f32 %v675_v58 }
 0x933   :  { %v674_v60 = vpop.xlane.xlu1 %673 }
 0x934   :  { %v676_v63 = vmax.f32 %v674_v60, 1e-16 }
 0x936   :  { %1711 = vrcp.f32 %v676_v63 }
 0x93c   :  { %v1710_v1 = vpop.eup %1709 }
 0x93d   :  { %v679_v3 = vmul.f32 %v1710_v1, %v1706_v52 }
 0x940   :  { %v1712_v2 = vpop.eup %1711 }
 0x941   :  { %v680_v4 = vmul.f32 %v1712_v2, %v1708_v54 }
 0x943   :  { %v681_v5 = vpack.c.bf16 %v680_v4, %v679_v3  ;;  %v2025_v3 = vld [vmem:[%s2103_s5 + $0x10] sm:$0x1f] }
 0x944   :  { %v885_v4 = vpack.c.bf16 %v2025_v3, %v2025_v3 }
 0x945   :  { %1573 = vmatmul.mubr.msk.bf16.vlgmr.msra.gmra.mrb[16].mxu1 %vm361_vm2, %v681_v5 }
 0x946   :  { %1592 = vmatprep.mubr.msk.bf16.mxu1 %vm1818_vm0, %v1817_v0  ;;  %1577 = vmatpush3.bf16.msra.mxu1 %v1677_v43 }
 0x947   :  { %1578 = vmatprep.subr.bf16.mxu1 %v1817_v0 }
 0x94a   :  { %1579 = vmatpush3.bf16.msra.mxu1 %v1678_v24 }
 0x94b   :  { %1580 = vmatprep.subr.bf16.mxu1 %v1817_v0 }
 0x94e   :  { %1581 = vmatpush3.bf16.msra.mxu1 %v1679_v25 }
 0x94f   :  { %1582 = vmatprep.subr.bf16.mxu1 %v1817_v0 }
 0x952   :  { %1583 = vmatpush3.bf16.msra.mxu1 %v1680_v26 }
 0x953   :  { %1584 = vmatprep.subr.bf16.mxu1 %v1817_v0 }
 0x956   :  { %1585 = vmatpush3.bf16.msra.mxu1 %v1681_v27 }
 0x957   :  { %1586 = vmatprep.subr.bf16.mxu1 %v1817_v0 }
 0x95a   :  { %1587 = vmatpush3.bf16.msra.mxu1 %v1682_v28 }
 0x95b   :  { %1588 = vmatprep.subr.bf16.mxu1 %v1817_v0 }
 0x95e   :  { %1589 = vmatpush3.bf16.msra.mxu1 %v1683_v29 }
 0x95f   :  { %1590 = vmatprep.subr.bf16.mxu1 %v1817_v0 }
 0x962   :  { %1591 = vmatpush3.bf16.msra.mxu1 %v1684_v30 }
 0x963   :  { %1628 = vmatprep.subr.bf16.mxu1 %v1817_v0 }
 0xa18   :  { %v723_v7 = vpop.f32.mrb[16].mxu1 }
 0xa19   :  { %v724_v8 = vadd.f32 %v723_v7, %v685_v6  ;;  %v1574_v9 = vpop.f32.mrb[17].mxu1 }
 0xa1a   :  { %v726_v10 = vpop.f32.mrb[18].mxu1 }
 0xa1b   :  { %v727_v11 = vadd.f32 %v726_v10, %v685_v6  ;;  %730 = vadd.xlane.f32.xlu1 %v724_v8  ;;  %v1575_v12 = vpop.f32.mrb[19].mxu1 }
 0xa1d   :  { %732 = vadd.xlane.f32.xlu0 %v727_v11 }
 0xaa8   :  { %v731_v13 = vpop.xlane.xlu1 %730 }
 0xaa9   :  { %v734_v14 = vmul.f32 0.03125, %v731_v13 }
 0xaaa   :  { %v733_v41 = vpop.xlane.xlu0 %732 }
 0xaab   :  { %v736_v15 = vsub.f32 %v724_v8, %v734_v14  ;;  %v735_v16 = vmul.f32 0.03125, %v733_v41 }
 0xaad   :  { %v737_v17 = vsub.f32 %v727_v11, %v735_v16  ;;  %v738_v18 = vmul.f32 %v1915_v33, %v736_v15 }
 0xaaf   :  { %v740_v19 = vmul.f32 %v738_v18, %v738_v18  ;;  %v739_v21 = vmul.f32 %v1915_v33, %v737_v17 }
 0xab1   :  { %742 = vadd.xlane.f32.xlu1 %v740_v19  ;;  %v741_v22 = vmul.f32 %v739_v21, %v739_v21 }
 0xab3   :  { %744 = vadd.xlane.f32.xlu0 %v741_v22 }
 0xb3e   :  { %v743_v31 = vpop.xlane.xlu1 %742 }
 0xb3f   :  { %v746_v32 = vmul.f32 0.03125, %v743_v31 }
 0xb40   :  { %v745_v34 = vpop.xlane.xlu0 %744 }
 0xb41   :  { %v748_v35 = vadd.f32 1e-05, %v746_v32  ;;  %v747_v36 = vmul.f32 0.03125, %v745_v34 }
 0xb43   :  { %1713 = vrsqrt.f32 %v748_v35  ;;  %v749_v37 = vadd.f32 1e-05, %v747_v36 }
 0xb45   :  { %1715 = vrsqrt.f32 %v749_v37 }
 0xb4d   :  { %v1714_v39 = vpop.eup %1713 }
 0xb4e   :  { %v752_v40 = vmul.f32 %v1714_v39, %v738_v18 }
 0xb4f   :  { %v1716_v44 = vpop.eup %1715 }
 0xb50   :  { %v753_v46 = vmul.f32 %v1716_v44, %v739_v21  ;;  %v758_v47 = vmul.f32 %v757_v38, %v752_v40 }
 0xb52   :  { %v759_v48 = vmul.f32 %v757_v38, %v753_v46  ;;  %v764_v49 = vadd.f32 %v763_v42, %v758_v47  ;;  %v978_v47 = vrot.slane %v2025_v3, %v1953_v23 }
 0xb54   :  { %v765_v50 = vadd.f32 %v763_v42, %v759_v48  ;;  %v766_v51 = vmul.f32 0.01, %v764_v49 }
 0xb56   :  { %v767_v52 = vmul.f32 0.01, %v765_v50  ;;  %v768_v53 = vmax.f32 %v764_v49, %v766_v51 }
 0xb58   :  { %v769_v54 = vmax.f32 %v765_v50, %v767_v52  ;;  %771 = vst [vmem:[#allocation7 + $0x20] sm:$0xff] %v768_v53 }
 0xb5a   :  { %772 = vst [vmem:[#allocation7 + $0x28] sm:$0xff] %v769_v54  ;;  %v792_v55 = vpack.c.bf16 %v769_v54, %v768_v53  ;;  %v1685_v54 = vld [vmem:[#allocation5 + $0xc0] sm:$0xff]  }
 0xb5c   :  { %1593 = vmatmul.mubr.bf16.vlgmr.msra.gmra.mrb[20].mxu1 %v792_v55 }
 0xb5d   :  { %1630 = vmatprep.mubr.msk.bf16.mxu1 %vm1818_vm0, %v1817_v0 }
 0xc2f   :  { %v875_v56 = vpop.f32.mrb[20].mxu1 }
 0xc30   :  { %928 = vperm.xlu1 %1651, %v875_v56   ;;  %v1594_v20 = vpop.f32.mrb[21].mxu1  ;;  %v882_v60 = vmul.f32 %v1915_v33, %v875_v56 }
 0xc31   :  { %v878_v58 = vpop.f32.mrb[22].mxu1 }
 0xc32   :  { %v883_v63 = vmul.f32 %v1915_v33, %v878_v58  ;;  %933 = vperm.xlu0 %1650, %v878_v58   ;;  %v1595_v1 = vpop.f32.mrb[23].mxu1 }
 0xc34   :  { %v884_v2 = vpack.c.bf16 %v883_v63, %v882_v60 }
 0xc36   :  { %1597 = vmatpush3.bf16.xpose.msra.mxu0 %v884_v2 }
 0xc37   :  { %1602 = vmatprep.subr.bf16.mxu0 %v1817_v0 }
 0xc3d   :  { %1599 = vmatmul.mubr.bf16.vlgmr.msra.gmra.mrb[8].mxu0 %v885_v4 }
 0xc3e   :  { %1603 = vmatpush3.bf16.msra.mxu0 %v884_v2  ;;  %1604 = vmatprep.mubr.msk.bf16.mxu0 %vm1818_vm0, %v1817_v0 }
 0xc3f   :  { %1608 = vmatprep.subr.bf16.mxu0 %v1817_v0 }
 0xcaf   :  { %v929_v6 = vpop.permute.xlu1 %928 }
 0xcb1   :  { %v934_v9 = vpop.permute.xlu0 %933 }
 0xd10   :  { %v920_v5 = vpop.f32.mrb[8].mxu0 }
 0xd11   :  { %v939_v7 = vrot.slane %v920_v5, %v1933_v45  ;;  %v1600_v8 = vpop.f32.mrb[9].mxu0 }
 0xd12   :  { %v923_v10 = vpop.f32.mrb[10].mxu0  ;;  %v1688_v8 = vld [vmem:[#allocation5 + $0xd8] sm:$0xff]  }
 0xd13   :  { %v940_v11 = vadd.f32 %v939_v7, %v929_v6  ;;  %v941_v12 = vadd.f32 %v939_v7, %v934_v9  ;;  %v1601_v43 = vpop.f32.mrb[11].mxu0  ;;  %v1686_v6 = vld [vmem:[#allocation5 + $0xc8] sm:$0xff]   ;;  %v1687_v7 = vld [vmem:[#allocation5 + $0xd0] sm:$0xff]   ;;  %v1689_v9 = vld [vmem:[#allocation5 + $0xe0] sm:$0xff]  }
 0xd14   :  { %v1690_v10 = vld [vmem:[#allocation5 + $0xe8] sm:$0xff]  }
 0xd15   :  { %v942_v13 = vmul.f32 0.2, %v940_v11  ;;  %v943_v14 = vmul.f32 0.2, %v941_v12 }
 0xd17   :  { %v945_v41 = vmax.f32 %v941_v12, %v943_v14  ;;  %v944_v15 = vmax.f32 %v940_v11, %v942_v13  ;;  %v1691_v11 = vld [vmem:[#allocation5 + $0xf0] sm:$0xff]   ;;  %v1692_v12 = vld [vmem:[#allocation5 + $0xf8] sm:$0xff]  }
 0xd19   :  { %v947_v16 = vadd.f32 %v1941_v59, %v945_v41  ;;  %v946_v17 = vadd.f32 %v1939_v57, %v944_v15 }
 0xd1b   :  { %v951_v18 = vsel %vm361_vm2, %v947_v16, -inf  ;;  %v948_v19 = vsel %vm361_vm2, %v946_v17, -inf }
 0xd1c   :  { %952 = vmax.xlane.f32.xlu0 %v951_v18  ;;  %949 = vmax.xlane.f32.xlu1 %v948_v19 }
 0xda9   :  { %v953_v21 = vpop.xlane.xlu0 %952  ;;  %v950_v22 = vpop.xlane.xlu1 %949 }
 0xdaa   :  { %v955_v24 = vmax.f32 %v953_v21, -1e+20  ;;  %v954_v25 = vmax.f32 %v950_v22, -1e+20  ;;  %v1056_v21 = vrot.slane %v2025_v3, %v1971_v62 }
 0xdac   :  { %v957_v26 = vsub.f32 %v947_v16, %v955_v24  ;;  %v956_v27 = vsub.f32 %v946_v17, %v954_v25  ;;  %v1050_v17 = vrot.slane %v2025_v3, %v1968_v61 }
 0xdae   :  { %v960_v28 = vmul.f32 1.442695, %v957_v26  ;;  %v958_v29 = vmul.f32 1.442695, %v956_v27 }
 0xdb0   :  { %1717 = vpow2.f32 %v960_v28 }
 0xdb1   :  { %1719 = vpow2.f32 %v958_v29 }
 0xdba   :  { %v1718_v30 = vpop.eup %1717 }
 0xdbb   :  { %v1720_v31 = vpop.eup %1719  ;;  %v965_v32 = vsel %vm361_vm2, %v1718_v30, 0.0 }
 0xdbc   :  { %966 = vadd.xlane.f32.xlu0 %v965_v32  ;;  %v962_v34 = vsel %vm361_vm2, %v1720_v31, 0.0 }
 0xdbd   :  { %963 = vadd.xlane.f32.xlu1 %v962_v34 }
 0xe49   :  { %v967_v35 = vpop.xlane.xlu0 %966 }
 0xe4a   :  { %v969_v36 = vmax.f32 %v967_v35, 1e-16  ;;  %v964_v37 = vpop.xlane.xlu1 %963 }
 0xe4b   :  { %v968_v38 = vmax.f32 %v964_v37, 1e-16 }
 0xe4c   :  { %1721 = vrcp.f32 %v969_v36 }
 0xe4d   :  { %1723 = vrcp.f32 %v968_v38 }
 0xe56   :  { %v1722_v39 = vpop.eup %1721 }
 0xe57   :  { %v1724_v40 = vpop.eup %1723  ;;  %v973_v42 = vmul.f32 %v1722_v39, %v1718_v30 }
 0xe58   :  { %v972_v44 = vmul.f32 %v1724_v40, %v1720_v31 }
 0xe5a   :  { %v974_v46 = vpack.c.bf16 %v973_v42, %v972_v44  ;;  %v2063_v42 = vld [vmem:[%s2103_s5 + $0x18] sm:$0x1f]  ;;  %s1820_s5 = smov [#allocation7]  }
 0xe5b   :  { %v1178_v44 = vpack.c.bf16 %v2063_v42, %v2063_v42  ;;  %s1364_s8 = sshll.u32 %s1820_s5, 4  ;;  %s1365_s8 = int_to_ptr.vmem [resolvable:$true] %s1364_s8 }
 0xe5c   :  { %1605 = vmatmul.mubr.msk.bf16.vlgmr.msra.gmra.mrb[12].mxu0 %vm361_vm2, %v974_v46  ;;  %s1785_s9 = scalar_lea.vmem %s1365_s8, 1280  ;;  %p1790_p3 = scmp.lt.s32.totalorder %s1365_s8, %s1365_s8 }
 0xe5d   :  { %1624 = vmatprep.mubr.msk.bf16.mxu0 %vm1818_vm0, %v1817_v0  ;;  %1609 = vmatpush3.bf16.msra.mxu0 %v1685_v54  ;;  %p1786_p2 = scmp.ne.s32.totalorder %s1365_s8, %s1785_s9  ;;  %p1791_p4 = scmp.lt.s32.totalorder %s1785_s9, %s1785_s9 }
 0xe5e   :  { %1610 = vmatprep.subr.bf16.mxu0 %v1817_v0 }
 0xe5f   :  { %p1792_p5 = por %p1791_p4, %p1790_p3 }
 0xe61   :  { %1611 = vmatpush3.bf16.msra.mxu0 %v1686_v6  ;;  %p1793_p6 = pnand %p1792_p5, %p1786_p2 }
 0xe62   :  { %1612 = vmatprep.subr.bf16.mxu0 %v1817_v0 }
 0xe65   :  { %1613 = vmatpush3.bf16.msra.mxu0 %v1687_v7 }
 0xe66   :  { %1614 = vmatprep.subr.bf16.mxu0 %v1817_v0 }
 0xe69   :  { %1615 = vmatpush3.bf16.msra.mxu0 %v1688_v8 }
 0xe6a   :  { %1616 = vmatprep.subr.bf16.mxu0 %v1817_v0 }
 0xe6d   :  { %1617 = vmatpush3.bf16.msra.mxu0 %v1689_v9 }
 0xe6e   :  { %1618 = vmatprep.subr.bf16.mxu0 %v1817_v0 }
 0xe71   :  { %1619 = vmatpush3.bf16.msra.mxu0 %v1690_v10 }
 0xe72   :  { %1620 = vmatprep.subr.bf16.mxu0 %v1817_v0 }
 0xe75   :  { %1621 = vmatpush3.bf16.msra.mxu0 %v1691_v11 }
 0xe76   :  { %1622 = vmatprep.subr.bf16.mxu0 %v1817_v0 }
 0xe79   :  { %1623 = vmatpush3.bf16.msra.mxu0 %v1692_v12 }
 0xf2f   :  { %v1016_v48 = vpop.f32.mrb[12].mxu0 }
 0xf30   :  { %v1017_v49 = vadd.f32 %v1016_v48, %v978_v47  ;;  %v1606_v50 = vpop.f32.mrb[13].mxu0 }
 0xf31   :  { %v1019_v51 = vpop.f32.mrb[14].mxu0 }
 0xf32   :  { %v1020_v52 = vadd.f32 %v1019_v51, %v978_v47  ;;  %1023 = vadd.xlane.f32.xlu1 %v1017_v49  ;;  %v1607_v53 = vpop.f32.mrb[15].mxu0 }
 0xf34   :  { %1025 = vadd.xlane.f32.xlu0 %v1020_v52 }
 0xfbf   :  { %v1024_v55 = vpop.xlane.xlu1 %1023 }
 0xfc0   :  { %v1027_v56 = vmul.f32 0.03125, %v1024_v55 }
 0xfc1   :  { %v1026_v20 = vpop.xlane.xlu0 %1025 }
 0xfc2   :  { %v1029_v58 = vsub.f32 %v1017_v49, %v1027_v56  ;;  %v1028_v60 = vmul.f32 0.03125, %v1026_v20 }
 0xfc4   :  { %v1030_v63 = vsub.f32 %v1020_v52, %v1028_v60  ;;  %v1031_v1 = vmul.f32 %v1915_v33, %v1029_v58 }
 0xfc6   :  { %v1033_v2 = vmul.f32 %v1031_v1, %v1031_v1  ;;  %v1032_v4 = vmul.f32 %v1915_v33, %v1030_v63 }
 0xfc8   :  { %1035 = vadd.xlane.f32.xlu1 %v1033_v2  ;;  %v1034_v5 = vmul.f32 %v1032_v4, %v1032_v4 }
 0xfca   :  { %1037 = vadd.xlane.f32.xlu0 %v1034_v5 }
0x1055   :  { %v1036_v43 = vpop.xlane.xlu1 %1035 }
0x1056   :  { %v1039_v13 = vmul.f32 0.03125, %v1036_v43 }
0x1057   :  { %v1038_v14 = vpop.xlane.xlu0 %1037 }
0x1058   :  { %v1041_v41 = vadd.f32 1e-05, %v1039_v13  ;;  %v1040_v15 = vmul.f32 0.03125, %v1038_v14 }
0x105a   :  { %1725 = vrsqrt.f32 %v1041_v41  ;;  %v1042_v16 = vadd.f32 1e-05, %v1040_v15 }
0x105c   :  { %1727 = vrsqrt.f32 %v1042_v16 }
0x1064   :  { %v1726_v18 = vpop.eup %1725 }
0x1065   :  { %v1045_v19 = vmul.f32 %v1726_v18, %v1031_v1 }
0x1066   :  { %v1728_v22 = vpop.eup %1727 }
0x1067   :  { %v1046_v24 = vmul.f32 %v1728_v22, %v1032_v4  ;;  %v1051_v25 = vmul.f32 %v1050_v17, %v1045_v19  ;;  %v1271_v19 = vrot.slane %v2063_v42, %v1953_v23 }
0x1069   :  { %v1052_v26 = vmul.f32 %v1050_v17, %v1046_v24  ;;  %v1057_v27 = vadd.f32 %v1056_v21, %v1051_v25 }
0x106b   :  { %v1058_v28 = vadd.f32 %v1056_v21, %v1052_v26  ;;  %v1059_v29 = vmul.f32 0.01, %v1057_v27 }
0x106d   :  { %v1060_v30 = vmul.f32 0.01, %v1058_v28  ;;  %v1061_v31 = vmax.f32 %v1057_v27, %v1059_v29 }
0x106f   :  { %v1062_v32 = vmax.f32 %v1058_v28, %v1060_v30  ;;  %1064 = vst [vmem:[#allocation7 + $0x30] sm:$0xff] %v1061_v31 }
0x1071   :  { %1065 = vst [vmem:[#allocation7 + $0x38] sm:$0xff] %v1062_v32  ;;  %v1085_v34 = vpack.c.bf16 %v1062_v32, %v1061_v31 }
0x1073   :  { %1625 = vmatmul.mubr.bf16.vlgmr.msra.gmra.mrb[16].mxu0 %v1085_v34 }
0x1146   :  { %v1168_v35 = vpop.f32.mrb[16].mxu0 }
0x1147   :  { %1221 = vperm.xlu1 %1651, %v1168_v35   ;;  %v1626_v36 = vpop.f32.mrb[17].mxu0  ;;  %v1175_v3 = vmul.f32 %v1915_v33, %v1168_v35 }
0x1148   :  { %v1171_v37 = vpop.f32.mrb[18].mxu0 }
0x1149   :  { %v1176_v38 = vmul.f32 %v1915_v33, %v1171_v37  ;;  %1226 = vperm.xlu0 %1650, %v1171_v37   ;;  %v1627_v39 = vpop.f32.mrb[19].mxu0 }
0x114b   :  { %v1177_v40 = vpack.c.bf16 %v1176_v38, %v1175_v3 }
0x114d   :  { %1629 = vmatpush3.bf16.xpose.msra.mxu1 %v1177_v40 }
0x114e   :  { %1634 = vmatprep.subr.bf16.mxu1 %v1817_v0 }
0x1154   :  { %1631 = vmatmul.mubr.bf16.vlgmr.msra.gmra.mrb[24].mxu1 %v1178_v44 }
0x1155   :  { %1635 = vmatpush3.bf16.msra.mxu1 %v1177_v40  ;;  %1636 = vmatprep.mubr.msk.bf16.mxu1 %vm1818_vm0, %v1817_v0 }
0x11c6   :  { %v1222_v47 = vpop.permute.xlu1 %1221 }
0x11c8   :  { %v1227_v50 = vpop.permute.xlu0 %1226 }
0x1227   :  { %v1213_v46 = vpop.f32.mrb[24].mxu1 }
0x1228   :  { %v1232_v48 = vrot.slane %v1213_v46, %v1933_v45  ;;  %v1632_v49 = vpop.f32.mrb[25].mxu1 }
0x1229   :  { %v1216_v51 = vpop.f32.mrb[26].mxu1  ;;  %v1349_v49 = vrot.slane %v2063_v42, %v1971_v62 }
0x122a   :  { %v1233_v52 = vadd.f32 %v1232_v48, %v1222_v47  ;;  %v1234_v53 = vadd.f32 %v1232_v48, %v1227_v50  ;;  %v1633_v54 = vpop.f32.mrb[27].mxu1  ;;  %v1343_v47 = vrot.slane %v2063_v42, %v1968_v61 }
0x122c   :  { %v1235_v55 = vmul.f32 0.2, %v1233_v52  ;;  %v1236_v56 = vmul.f32 0.2, %v1234_v53 }
0x122e   :  { %v1238_v20 = vmax.f32 %v1234_v53, %v1236_v56  ;;  %v1237_v58 = vmax.f32 %v1233_v52, %v1235_v55 }
0x1230   :  { %v1240_v60 = vadd.f32 %v1941_v59, %v1238_v20  ;;  %v1239_v63 = vadd.f32 %v1939_v57, %v1237_v58 }
0x1232   :  { %v1244_v0 = vsel %vm361_vm2, %v1240_v60, -inf  ;;  %v1241_v1 = vsel %vm361_vm2, %v1239_v63, -inf }
0x1233   :  { %1245 = vmax.xlane.f32.xlu0 %v1244_v0  ;;  %1242 = vmax.xlane.f32.xlu1 %v1241_v1 }
0x12c0   :  { %v1246_v45 = vpop.xlane.xlu0 %1245  ;;  %v1243_v2 = vpop.xlane.xlu1 %1242 }
0x12c1   :  { %v1248_v4 = vmax.f32 %v1246_v45, -1e+20  ;;  %v1247_v5 = vmax.f32 %v1243_v2, -1e+20 }
0x12c3   :  { %v1250_v6 = vsub.f32 %v1240_v60, %v1248_v4  ;;  %v1249_v7 = vsub.f32 %v1239_v63, %v1247_v5 }
0x12c5   :  { %v1253_v8 = vmul.f32 1.442695, %v1250_v6  ;;  %v1251_v9 = vmul.f32 1.442695, %v1249_v7 }
0x12c7   :  { %1729 = vpow2.f32 %v1253_v8 }
0x12c8   :  { %1731 = vpow2.f32 %v1251_v9 }
0x12d1   :  { %v1730_v10 = vpop.eup %1729 }
0x12d2   :  { %v1732_v59 = vpop.eup %1731  ;;  %v1258_v57 = vsel %vm361_vm2, %v1730_v10, 0.0 }
0x12d3   :  { %1259 = vadd.xlane.f32.xlu0 %v1258_v57  ;;  %v1255_v11 = vsel %vm361_vm2, %v1732_v59, 0.0 }
0x12d4   :  { %1256 = vadd.xlane.f32.xlu1 %v1255_v11 }
0x1360   :  { %v1260_v12 = vpop.xlane.xlu0 %1259 }
0x1361   :  { %v1262_v43 = vmax.f32 %v1260_v12, 1e-16  ;;  %v1257_v13 = vpop.xlane.xlu1 %1256 }
0x1362   :  { %v1261_v14 = vmax.f32 %v1257_v13, 1e-16 }
0x1363   :  { %1733 = vrcp.f32 %v1262_v43 }
0x1364   :  { %1735 = vrcp.f32 %v1261_v14 }
0x136d   :  { %v1734_v41 = vpop.eup %1733 }
0x136e   :  { %v1736_v15 = vpop.eup %1735  ;;  %v1266_v16 = vmul.f32 %v1734_v41, %v1730_v10 }
0x136f   :  { %v1265_v17 = vmul.f32 %v1736_v15, %v1732_v59 }
0x1371   :  { %v1267_v18 = vpack.c.bf16 %v1266_v16, %v1265_v17 }
0x1373   :  { %1637 = vmatmul.mubr.msk.bf16.vlgmr.msra.gmra.mrb[28].mxu1 %vm361_vm2, %v1267_v18 }
0x1446   :  { %v1309_v21 = vpop.f32.mrb[28].mxu1 }
0x1447   :  { %v1310_v22 = vadd.f32 %v1309_v21, %v1271_v19  ;;  %v1638_v24 = vpop.f32.mrb[29].mxu1 }
0x1448   :  { %v1312_v25 = vpop.f32.mrb[30].mxu1 }
0x1449   :  { %v1313_v26 = vadd.f32 %v1312_v25, %v1271_v19  ;;  %1316 = vadd.xlane.f32.xlu1 %v1310_v22  ;;  %v1639_v27 = vpop.f32.mrb[31].mxu1 }
0x144b   :  { %1318 = vadd.xlane.f32.xlu0 %v1313_v26 }
0x14d6   :  { %v1317_v28 = vpop.xlane.xlu1 %1316 }
0x14d7   :  { %v1320_v29 = vmul.f32 0.03125, %v1317_v28 }
0x14d8   :  { %v1319_v30 = vpop.xlane.xlu0 %1318 }
0x14d9   :  { %v1322_v31 = vsub.f32 %v1310_v22, %v1320_v29  ;;  %v1321_v32 = vmul.f32 0.03125, %v1319_v30 }
0x14db   :  { %v1323_v34 = vsub.f32 %v1313_v26, %v1321_v32  ;;  %v1324_v35 = vmul.f32 %v1915_v33, %v1322_v31 }
0x14dd   :  { %v1326_v36 = vmul.f32 %v1324_v35, %v1324_v35  ;;  %v1325_v37 = vmul.f32 %v1915_v33, %v1323_v34 }
0x14df   :  { %1328 = vadd.xlane.f32.xlu1 %v1326_v36  ;;  %v1327_v23 = vmul.f32 %v1325_v37, %v1325_v37 }
0x14e1   :  { %1330 = vadd.xlane.f32.xlu0 %v1327_v23 }
0x156c   :  { %v1329_v3 = vpop.xlane.xlu1 %1328 }
0x156d   :  { %v1332_v38 = vmul.f32 0.03125, %v1329_v3 }
0x156e   :  { %v1331_v39 = vpop.xlane.xlu0 %1330 }
0x156f   :  { %v1334_v40 = vadd.f32 1e-05, %v1332_v38  ;;  %v1333_v44 = vmul.f32 0.03125, %v1331_v39 }
0x1571   :  { %1737 = vrsqrt.f32 %v1334_v40  ;;  %v1335_v46 = vadd.f32 1e-05, %v1333_v44 }
0x1573   :  { %1739 = vrsqrt.f32 %v1335_v46 }
0x157b   :  { %v1738_v48 = vpop.eup %1737 }
0x157c   :  { %v1338_v50 = vmul.f32 %v1738_v48, %v1324_v35 }
0x157d   :  { %v1740_v33 = vpop.eup %1739 }
0x157e   :  { %v1344_v51 = vmul.f32 %v1343_v47, %v1338_v50  ;;  %v1339_v52 = vmul.f32 %v1740_v33, %v1325_v37 }
0x1580   :  { %v1350_v53 = vadd.f32 %v1349_v49, %v1344_v51  ;;  %v1345_v54 = vmul.f32 %v1343_v47, %v1339_v52 }
0x1582   :  { %v1352_v55 = vmul.f32 0.01, %v1350_v53  ;;  %v1351_v56 = vadd.f32 %v1349_v49, %v1345_v54 }
0x1584   :  { %v1354_v20 = vmax.f32 %v1350_v53, %v1352_v55  ;;  %v1353_v58 = vmul.f32 0.01, %v1351_v56 }
0x1586   :  { %1357 = vst [vmem:[#allocation7 + $0x40] sm:$0xff] %v1354_v20  ;;  %v1355_v60 = vmax.f32 %v1351_v56, %v1353_v58 }
0x1588   :  { %1358 = vst [vmem:[#allocation7 + $0x48] sm:$0xff] %v1355_v60 }
0x1589   :  { %1796 = shalt.err (!%p1793_p6)
}
0x158a   :  { %s1797_s12 = scalar_lea.hbm %s2104_s6, 1280 }
0x158b   :  { %p1798_p7 = scmp.ne.s32.totalorder %s2104_s6, %s1797_s12  ;;  %p1801_p8 = scmp.lt.u32.totalorder %s1797_s12, %s2104_s6 }
0x158d   :  { %p1803_p9 = pnand %p1801_p8, %p1798_p7 }
0x158f   :  { %1806 = shalt.err (!%p1803_p9)
}
0x1590   :  { %s1821_s17 = smov 128   ;;  %s1822_s18 = smov 8  }
0x1591   :  { %1370 = dma.vmem_to_hbm [thread:$0]  %s1365_s8, 1280, %s2104_s6, [#allocation4], %s1821_s17, %s1821_s17, %s1822_s18  }
0x1592   :  { %1811 = dma.done.wait [#allocation4], 1280  }
0x1593   :  { %1812 = vsyncadd [#allocation4], 4294966016 }
0x1594   :  { %1374 = vsyncpa [#allocation3], 1 }
0x1595   :  { %1375 = vsyncpa [#allocation6], 1 }
0x1596   :  { %1376 = vsyncpa [#allocation4], 1 }

</bundles_post_ra>
